<compile_context>
chip_gen: v6e
topology: v6e:2x2x1
jax: 0.10.0
libtpu: 0.0.40
codegen_flags: <defaults>
</compile_context>

<pallas_src>
import math

import jax
import jax.numpy as jnp
from jax.experimental import pallas as pl
from jax.experimental.pallas import tpu as pltpu

# ----------------------------- config ------------------------------------
BATCH = 2
CHANNELS = 3
IMG = 16
PATCH = 8
HIDDEN = 32
HEADS = 4
HEAD_DIM = HIDDEN // HEADS
MLP = 64
DEPTH = 2
LN_EPS = 1e-12  # HF ViT layer_norm_eps

N_PATCHES = (IMG // PATCH) ** 2          # 4
T_REAL = N_PATCHES + 1                   # 5 tokens ([CLS] + patches)
T_PAD = 8                                # pad token axis to sublane multiple
PATCH_IN = CHANNELS * PATCH * PATCH      # 192
W_SLAB_COLS = 4 * HIDDEN + 2 * MLP       # 256  (wqkv | wo | w1 | w2ᵀ)
V_SLAB_COLS = 3 * HIDDEN                 # 96   (bias/LN rows padded to 96 lanes)


# --------------------------- fused ViT kernel -------------------------------
# One invocation per batch element (grid=(B,), "parallel").
#   patches_ref : [1, T_PAD, PATCH_IN]  row 0 = CLS slot (zeros), rows 1..NP patches
#   pw_ref      : [PATCH_IN, HIDDEN]    patch projection weight
#   misc_ref    : [T_PAD+2, HIDDEN]     rows 0..T_PAD-1: additive embed (cls/pos/bias),
#                                       row T_PAD: final-LN gamma, row T_PAD+1: beta
#   wslab_ref   : [DEPTH, HIDDEN, 256]  wqkv | wo | w1 | w2ᵀ  (Q cols pre-scaled)
#   vslab_ref   : [DEPTH, 8, 96]        ln1_g, ln1_b, bqkv, bo, ln2_g, ln2_b, b1, b2
#   o_ref       : [1, 1, HIDDEN]        final-LN CLS features for this batch element
def _vit_kernel(patches_ref, pw_ref, misc_ref, wslab_ref, vslab_ref, o_ref):
    D, T, F = HIDDEN, T_PAD, MLP

    def ln(x, g, b):
        mu = jnp.mean(x, axis=-1, keepdims=True)
        var = jnp.mean(jnp.square(x - mu), axis=-1, keepdims=True)
        return (x - mu) * jax.lax.rsqrt(var + LN_EPS) * g + b

    # ---- patch embed + CLS insertion + positional add (pad rows stay zero) ----
    tok = jnp.dot(patches_ref[0], pw_ref[...], preferred_element_type=jnp.float32)
    h = tok + misc_ref[0:T, :]                                   # [T, D]

    # keys beyond the real token count are masked out of attention (hoisted)
    key_mask = jax.lax.broadcasted_iota(jnp.int32, (1, 1, T), 2) < T_REAL

    for l in range(DEPTH):                                       # static unrolled
        w = wslab_ref[l]                                         # [D, 256]
        vs = vslab_ref[l]                                        # [8, 96]
        ln1_g, ln1_b = vs[0:1, :D], vs[1:2, :D]
        bqkv = vs[2:3, :]                                        # [1, 3D]
        bo = vs[3:4, :D]
        ln2_g, ln2_b = vs[4:5, :D], vs[5:6, :D]
        b1 = vs[6:7, :F]
        b2 = vs[7:8, :D]
        wqkv = w[:, 0:3 * D]                                     # [D, 3D]
        wo = w[:, 3 * D:4 * D]                                   # [D, D]
        w1 = w[:, 4 * D:4 * D + F]                               # [D, F]
        w2t = w[:, 4 * D + F:4 * D + 2 * F]                      # [D, F] (= w2ᵀ)

        # ----- multi-head self-attention (pre-LN); 1/sqrt(dh) folded into wqkv -----
        x1 = ln(h, ln1_g, ln1_b)
        qkv = jnp.dot(x1, wqkv, preferred_element_type=jnp.float32) + bqkv  # [T, 3D]
        q = qkv[:, 0:D].reshape(T, HEADS, HEAD_DIM).transpose(1, 0, 2)      # [H,T,dh]
        k = qkv[:, D:2 * D].reshape(T, HEADS, HEAD_DIM).transpose(1, 0, 2)
        v = qkv[:, 2 * D:3 * D].reshape(T, HEADS, HEAD_DIM).transpose(1, 0, 2)
        s = jnp.einsum("htd,hsd->hts", q, k,
                       preferred_element_type=jnp.float32)                 # [H,T,T]
        s = jnp.where(key_mask, s, -1e30)
        m = jnp.max(s, axis=-1, keepdims=True)
        p = jnp.exp(s - m)
        p = p / jnp.sum(p, axis=-1, keepdims=True)               # exact softmax
        av = jnp.einsum("hts,hsd->htd", p, v,
                        preferred_element_type=jnp.float32)                # [H,T,dh]
        attn = jnp.dot(av.transpose(1, 0, 2).reshape(T, D), wo,
                       preferred_element_type=jnp.float32) + bo
        h = h + attn                                             # residual

        # ----- MLP (pre-LN) -----
        x2 = ln(h, ln2_g, ln2_b)
        m1 = jnp.dot(x2, w1, preferred_element_type=jnp.float32) + b1
        # TODO(synk): HF ViT uses exact-erf GELU; tanh approximation used here.
        m1 = jax.nn.gelu(m1, approximate=True)
        m2 = jax.lax.dot_general(m1, w2t, (((1,), (1,)), ((), ())),
                                 preferred_element_type=jnp.float32) + b2
        h = h + m2                                               # residual

    # ----- final LayerNorm on CLS token -----
    cls = h[0:1, :]                                              # [1, D]
    lnf_g = misc_ref[T:T + 1, :]
    lnf_b = misc_ref[T + 1:T + 2, :]
    o_ref[...] = ln(cls, lnf_g, lnf_b).reshape(1, 1, D).astype(o_ref.dtype)


# --------------------------- parameters -------------------------------------
def init_params(key):
    keys = iter(jax.random.split(key, 16))

    def nrm(shape, scale=0.02):
        return scale * jax.random.normal(next(keys), shape, dtype=jnp.float32)

    return {
        "patch_w": nrm((PATCH_IN, HIDDEN)),
        "patch_b": jnp.zeros((1, HIDDEN), jnp.float32),
        "cls": nrm((1, HIDDEN)),
        "pos": nrm((T_REAL, HIDDEN)),
        "lnf_g": jnp.ones((1, HIDDEN), jnp.float32),
        "lnf_b": jnp.zeros((1, HIDDEN), jnp.float32),
        # per-layer weights stacked along a leading DEPTH axis
        "ln1_g": jnp.ones((DEPTH, 1, HIDDEN), jnp.float32),
        "ln1_b": jnp.zeros((DEPTH, 1, HIDDEN), jnp.float32),
        "wqkv": nrm((DEPTH, HIDDEN, 3 * HIDDEN)),
        "bqkv": jnp.zeros((DEPTH, 1, 3 * HIDDEN), jnp.float32),
        "wo": nrm((DEPTH, HIDDEN, HIDDEN)),
        "bo": jnp.zeros((DEPTH, 1, HIDDEN), jnp.float32),
        "ln2_g": jnp.ones((DEPTH, 1, HIDDEN), jnp.float32),
        "ln2_b": jnp.zeros((DEPTH, 1, HIDDEN), jnp.float32),
        "w1": nrm((DEPTH, HIDDEN, MLP)),
        "b1": jnp.zeros((DEPTH, 1, MLP), jnp.float32),
        "w2": nrm((DEPTH, MLP, HIDDEN)),
        "b2": jnp.zeros((DEPTH, 1, HIDDEN), jnp.float32),
    }


# ----------------------------- forward pass ---------------------------------
def simple_vit_forward(params, x):
    """x: [B, C, H, W] (NCHW).  Returns [B, HIDDEN] final-LN CLS features."""
    B, C, H, W = x.shape
    p = PATCH
    Hp, Wp = H // p, W // p
    NP = Hp * Wp

    # Conv2d(k=p, stride=p) patch embedding == im2col reshape (glue, done once).
    patches = x.reshape(B, C, Hp, p, Wp, p).transpose(0, 2, 4, 1, 3, 5)
    patches = patches.reshape(B, NP, C * p * p)
    # Row 0 reserved for CLS, pad token axis to T_PAD (pad rows zero).
    patches = jnp.pad(patches, ((0, 0), (1, T_PAD - 1 - NP), (0, 0)))

    # Additive embedding rows: row0 = cls + pos[0]; rows 1..NP = patch_b + pos; pad rows 0.
    emb_add = jnp.zeros((T_PAD, HIDDEN), jnp.float32)
    emb_add = emb_add.at[0].set(params["cls"][0] + params["pos"][0])
    emb_add = emb_add.at[1:T_REAL].set(params["patch_b"] + params["pos"][1:T_REAL])
    misc = jnp.concatenate([emb_add, params["lnf_g"], params["lnf_b"]], axis=0)

    # Pack per-layer weights into one matrix slab; fold 1/sqrt(dh) into Q columns.
    scale = 1.0 / math.sqrt(HEAD_DIM)
    wqkv = params["wqkv"].at[:, :, :HIDDEN].multiply(scale)
    bqkv = params["bqkv"].at[:, :, :HIDDEN].multiply(scale)
    w2t = jnp.transpose(params["w2"], (0, 2, 1))
    w_slab = jnp.concatenate([wqkv, params["wo"], params["w1"], w2t], axis=-1)

    def row(a, width=V_SLAB_COLS):
        return jnp.pad(a, ((0, 0), (0, 0), (0, width - a.shape[-1])))

    v_slab = jnp.concatenate(
        [row(params["ln1_g"]), row(params["ln1_b"]), bqkv, row(params["bo"]),
         row(params["ln2_g"]), row(params["ln2_b"]), row(params["b1"]),
         row(params["b2"])], axis=1)                              # [DEPTH, 8, 96]

    out = pl.pallas_call(
        _vit_kernel,
        out_shape=jax.ShapeDtypeStruct((B, 1, HIDDEN), jnp.float32),
        grid=(B,),
        in_specs=[
            pl.BlockSpec((1, T_PAD, PATCH_IN), lambda b: (b, 0, 0)),
            pl.BlockSpec((PATCH_IN, HIDDEN), lambda b: (0, 0)),
            pl.BlockSpec((T_PAD + 2, HIDDEN), lambda b: (0, 0)),
            pl.BlockSpec((DEPTH, HIDDEN, W_SLAB_COLS), lambda b: (0, 0, 0)),
            pl.BlockSpec((DEPTH, 8, V_SLAB_COLS), lambda b: (0, 0, 0)),
        ],
        out_specs=pl.BlockSpec((1, 1, HIDDEN), lambda b: (b, 0, 0)),
        compiler_params=pltpu.CompilerParams(dimension_semantics=("parallel",)),
    )(patches, params["patch_w"], misc, w_slab, v_slab)

    # head = nn.Identity(): return final-LayerNorm CLS-token features.
    return out.reshape(B, HIDDEN)


# ------------------------------- main ----------------------------------------
if __name__ == "__main__":
    key = jax.random.PRNGKey(0)
    k_params, k_x = jax.random.split(key)
    params = init_params(k_params)
    x = jax.random.normal(k_x, (BATCH, CHANNELS, IMG, IMG), dtype=jnp.float32)

    fwd = jax.jit(simple_vit_forward)
    out = jax.block_until_ready(fwd(params, x))
    assert out.shape == (BATCH, HIDDEN), out.shape
    assert bool(jnp.all(jnp.isfinite(out)))
    print("KERNEL_OK")
</pallas_src>

<mosaic_0001>
module attributes {stable_mosaic.version = 11 : i64} {
  func.func @_vit_kernel(%arg0: i32, %arg1: memref<1x8x192xf32, #tpu.memory_space<vmem>>, %arg2: memref<192x32xf32, #tpu.memory_space<vmem>>, %arg3: memref<10x32xf32, #tpu.memory_space<vmem>>, %arg4: memref<2x32x256xf32, #tpu.memory_space<vmem>>, %arg5: memref<2x8x96xf32, #tpu.memory_space<vmem>>, %arg6: memref<1x1x32xf32, #tpu.memory_space<vmem>>) attributes {dimension_semantics = [#tpu.dimension_semantics<parallel>], iteration_bounds = array<i64: 2>, scalar_prefetch = 0 : i64, scratch_operands = 0 : i64, tpu.core_type = #tpu.core_type<tc>, window_params = [{transform_indices = @transform_0, window_bounds = array<i64: 1, 8, 192>}, {pipeline_mode = #tpu.pipeline_mode<synchronous>, transform_indices = @transform_1, window_bounds = array<i64: 192, 32>}, {pipeline_mode = #tpu.pipeline_mode<synchronous>, transform_indices = @transform_2, window_bounds = array<i64: 10, 32>}, {pipeline_mode = #tpu.pipeline_mode<synchronous>, transform_indices = @transform_3, window_bounds = array<i64: 2, 32, 256>}, {pipeline_mode = #tpu.pipeline_mode<synchronous>, transform_indices = @transform_4, window_bounds = array<i64: 2, 8, 96>}, {transform_indices = @transform_5, window_bounds = array<i64: 1, 1, 32>}]} {
    %c0 = arith.constant 0 : index
    %c0_0 = arith.constant 0 : index
    %c0_1 = arith.constant 0 : index
    %0 = vector.load %arg1[%c0, %c0_0, %c0_1] : memref<1x8x192xf32, #tpu.memory_space<vmem>>, vector<1x8x192xf32>
    %1 = vector.shape_cast %0 : vector<1x8x192xf32> to vector<8x192xf32>
    %c0_2 = arith.constant 0 : index
    %c0_3 = arith.constant 0 : index
    %2 = vector.load %arg2[%c0_2, %c0_3] : memref<192x32xf32, #tpu.memory_space<vmem>>, vector<192x32xf32>
    %cst = arith.constant dense<0.000000e+00> : vector<8x32xf32>
    %3 = tpu.matmul %1, %2, %cst {dimension_numbers = #tpu.dot_dimension_numbers<[1], [0], [0], [1], [0, 0, 1, 1], [], []>} : vector<8x192xf32>, vector<192x32xf32>, vector<8x32xf32> -> vector<8x32xf32>
    %c0_4 = arith.constant 0 : index
    %c0_5 = arith.constant 0 : index
    %4 = vector.load %arg3[%c0_4, %c0_5] : memref<10x32xf32, #tpu.memory_space<vmem>>, vector<8x32xf32>
    %5 = arith.addf %3, %4 : vector<8x32xf32>
    %6 = tpu.iota {dimensions = array<i32: 2>} : vector<1x1x8xi32>
    %c5_i32 = arith.constant 5 : i32
    %7 = vector.broadcast %c5_i32 : i32 to vector<1x1x8xi32>
    %8 = arith.cmpi slt, %6, %7 : vector<1x1x8xi32>
    %c0_6 = arith.constant 0 : index
    %c0_7 = arith.constant 0 : index
    %c0_8 = arith.constant 0 : index
    %9 = vector.load %arg4[%c0_6, %c0_7, %c0_8] : memref<2x32x256xf32, #tpu.memory_space<vmem>>, vector<1x32x256xf32>
    %10 = vector.shape_cast %9 : vector<1x32x256xf32> to vector<32x256xf32>
    %c0_9 = arith.constant 0 : index
    %c0_10 = arith.constant 0 : index
    %c0_11 = arith.constant 0 : index
    %11 = vector.load %arg5[%c0_9, %c0_10, %c0_11] : memref<2x8x96xf32, #tpu.memory_space<vmem>>, vector<1x8x96xf32>
    %12 = vector.shape_cast %11 : vector<1x8x96xf32> to vector<8x96xf32>
    %13 = vector.extract_strided_slice %12 {offsets = [0, 0], sizes = [1, 32], strides = [1, 1]} : vector<8x96xf32> to vector<1x32xf32>
    %14 = vector.extract_strided_slice %12 {offsets = [1, 0], sizes = [1, 32], strides = [1, 1]} : vector<8x96xf32> to vector<1x32xf32>
    %15 = vector.extract_strided_slice %12 {offsets = [2, 0], sizes = [1, 96], strides = [1, 1]} : vector<8x96xf32> to vector<1x96xf32>
    %16 = vector.extract_strided_slice %12 {offsets = [3, 0], sizes = [1, 32], strides = [1, 1]} : vector<8x96xf32> to vector<1x32xf32>
    %17 = vector.extract_strided_slice %12 {offsets = [4, 0], sizes = [1, 32], strides = [1, 1]} : vector<8x96xf32> to vector<1x32xf32>
    %18 = vector.extract_strided_slice %12 {offsets = [5, 0], sizes = [1, 32], strides = [1, 1]} : vector<8x96xf32> to vector<1x32xf32>
    %19 = vector.extract_strided_slice %12 {offsets = [6, 0], sizes = [1, 64], strides = [1, 1]} : vector<8x96xf32> to vector<1x64xf32>
    %20 = vector.extract_strided_slice %12 {offsets = [7, 0], sizes = [1, 32], strides = [1, 1]} : vector<8x96xf32> to vector<1x32xf32>
    %21 = vector.extract_strided_slice %10 {offsets = [0, 0], sizes = [32, 96], strides = [1, 1]} : vector<32x256xf32> to vector<32x96xf32>
    %22 = vector.extract_strided_slice %10 {offsets = [0, 96], sizes = [32, 32], strides = [1, 1]} : vector<32x256xf32> to vector<32x32xf32>
    %23 = vector.extract_strided_slice %10 {offsets = [0, 128], sizes = [32, 64], strides = [1, 1]} : vector<32x256xf32> to vector<32x64xf32>
    %24 = vector.extract_strided_slice %10 {offsets = [0, 192], sizes = [32, 64], strides = [1, 1]} : vector<32x256xf32> to vector<32x64xf32>
    %cst_12 = arith.constant dense<0.000000e+00> : vector<8xf32>
    %25 = vector.multi_reduction <add>, %5, %cst_12 [1] : vector<8x32xf32> to vector<8xf32>
    %26 = vector.shape_cast %25 : vector<8xf32> to vector<8x1xf32>
    %cst_13 = arith.constant 3.200000e+01 : f32
    %27 = vector.broadcast %cst_13 : f32 to vector<8x1xf32>
    %28 = arith.divf %26, %27 : vector<8x1xf32>
    %29 = vector.broadcast %28 : vector<8x1xf32> to vector<8x32xf32>
    %30 = arith.subf %5, %29 : vector<8x32xf32>
    %31 = arith.mulf %30, %30 : vector<8x32xf32>
    %cst_14 = arith.constant dense<0.000000e+00> : vector<8xf32>
    %32 = vector.multi_reduction <add>, %31, %cst_14 [1] : vector<8x32xf32> to vector<8xf32>
    %33 = vector.shape_cast %32 : vector<8xf32> to vector<8x1xf32>
    %cst_15 = arith.constant 3.200000e+01 : f32
    %34 = vector.broadcast %cst_15 : f32 to vector<8x1xf32>
    %35 = arith.divf %33, %34 : vector<8x1xf32>
    %36 = vector.broadcast %28 : vector<8x1xf32> to vector<8x32xf32>
    %37 = arith.subf %5, %36 : vector<8x32xf32>
    %cst_16 = arith.constant 9.99999996E-13 : f32
    %38 = vector.broadcast %cst_16 : f32 to vector<8x1xf32>
    %39 = arith.addf %35, %38 : vector<8x1xf32>
    %40 = math.rsqrt %39 : vector<8x1xf32>
    %41 = vector.broadcast %40 : vector<8x1xf32> to vector<8x32xf32>
    %42 = arith.mulf %37, %41 : vector<8x32xf32>
    %43 = vector.broadcast %13 : vector<1x32xf32> to vector<8x32xf32>
    %44 = arith.mulf %42, %43 : vector<8x32xf32>
    %45 = vector.broadcast %14 : vector<1x32xf32> to vector<8x32xf32>
    %46 = arith.addf %44, %45 : vector<8x32xf32>
    %cst_17 = arith.constant dense<0.000000e+00> : vector<8x96xf32>
    %47 = tpu.matmul %46, %21, %cst_17 {dimension_numbers = #tpu.dot_dimension_numbers<[1], [0], [0], [1], [0, 0, 1, 1], [], []>} : vector<8x32xf32>, vector<32x96xf32>, vector<8x96xf32> -> vector<8x96xf32>
    %48 = vector.broadcast %15 : vector<1x96xf32> to vector<8x96xf32>
    %49 = arith.addf %47, %48 : vector<8x96xf32>
    %50 = vector.extract_strided_slice %49 {offsets = [0, 0], sizes = [8, 32], strides = [1, 1]} : vector<8x96xf32> to vector<8x32xf32>
    %51 = vector.shape_cast %50 : vector<8x32xf32> to vector<8x4x8xf32>
    %52 = tpu.transpose %51, [1, 0, 2] : vector<8x4x8xf32> -> vector<4x8x8xf32>
    %53 = vector.extract_strided_slice %49 {offsets = [0, 32], sizes = [8, 32], strides = [1, 1]} : vector<8x96xf32> to vector<8x32xf32>
    %54 = vector.shape_cast %53 : vector<8x32xf32> to vector<8x4x8xf32>
    %55 = tpu.transpose %54, [1, 0, 2] : vector<8x4x8xf32> -> vector<4x8x8xf32>
    %56 = vector.extract_strided_slice %49 {offsets = [0, 64], sizes = [8, 32], strides = [1, 1]} : vector<8x96xf32> to vector<8x32xf32>
    %57 = vector.shape_cast %56 : vector<8x32xf32> to vector<8x4x8xf32>
    %58 = tpu.transpose %57, [1, 0, 2] : vector<8x4x8xf32> -> vector<4x8x8xf32>
    "tpu.trace_start"() <{level = 10 : i32, message = "htd,hsd->hts"}> : () -> ()
    %cst_18 = arith.constant dense<0.000000e+00> : vector<4x8x8xf32>
    %59 = tpu.matmul %52, %55, %cst_18 {dimension_numbers = #tpu.dot_dimension_numbers<[2], [2], [1], [1], [0, 0, 0, 1, 1, 1], [0], [0]>} : vector<4x8x8xf32>, vector<4x8x8xf32>, vector<4x8x8xf32> -> vector<4x8x8xf32>
    %cst_19 = arith.constant -1.000000e+30 : f32
    "tpu.trace_stop"() : () -> ()
    %60 = vector.shape_cast %8 : vector<1x1x8xi1> to vector<1x1x8xi1>
    %61 = vector.broadcast %60 : vector<1x1x8xi1> to vector<4x8x8xi1>
    %62 = vector.broadcast %cst_19 : f32 to vector<4x8x8xf32>
    %63 = arith.select %61, %59, %62 : vector<4x8x8xi1>, vector<4x8x8xf32>
    %cst_20 = arith.constant dense<0xFF800000> : vector<4x8xf32>
    %64 = vector.multi_reduction <maximumf>, %63, %cst_20 [2] : vector<4x8x8xf32> to vector<4x8xf32>
    %65 = vector.shape_cast %64 : vector<4x8xf32> to vector<4x8x1xf32>
    %66 = vector.broadcast %65 : vector<4x8x1xf32> to vector<4x8x8xf32>
    %67 = arith.subf %63, %66 : vector<4x8x8xf32>
    %68 = math.exp %67 : vector<4x8x8xf32>
    %cst_21 = arith.constant dense<0.000000e+00> : vector<4x8xf32>
    %69 = vector.multi_reduction <add>, %68, %cst_21 [2] : vector<4x8x8xf32> to vector<4x8xf32>
    %70 = vector.shape_cast %69 : vector<4x8xf32> to vector<4x8x1xf32>
    %71 = vector.broadcast %70 : vector<4x8x1xf32> to vector<4x8x8xf32>
    %72 = arith.divf %68, %71 : vector<4x8x8xf32>
    "tpu.trace_start"() <{level = 10 : i32, message = "hts,hsd->htd"}> : () -> ()
    %cst_22 = arith.constant dense<0.000000e+00> : vector<4x8x8xf32>
    %73 = tpu.matmul %72, %58, %cst_22 {dimension_numbers = #tpu.dot_dimension_numbers<[2], [1], [1], [2], [0, 0, 0, 1, 1, 2], [0], [0]>} : vector<4x8x8xf32>, vector<4x8x8xf32>, vector<4x8x8xf32> -> vector<4x8x8xf32>
    "tpu.trace_stop"() : () -> ()
    %74 = tpu.transpose %73, [1, 0, 2] : vector<4x8x8xf32> -> vector<8x4x8xf32>
    %75 = vector.shape_cast %74 : vector<8x4x8xf32> to vector<8x32xf32>
    %cst_23 = arith.constant dense<0.000000e+00> : vector<8x32xf32>
    %76 = tpu.matmul %75, %22, %cst_23 {dimension_numbers = #tpu.dot_dimension_numbers<[1], [0], [0], [1], [0, 0, 1, 1], [], []>} : vector<8x32xf32>, vector<32x32xf32>, vector<8x32xf32> -> vector<8x32xf32>
    %77 = vector.broadcast %16 : vector<1x32xf32> to vector<8x32xf32>
    %78 = arith.addf %76, %77 : vector<8x32xf32>
    %79 = arith.addf %5, %78 : vector<8x32xf32>
    %cst_24 = arith.constant dense<0.000000e+00> : vector<8xf32>
    %80 = vector.multi_reduction <add>, %79, %cst_24 [1] : vector<8x32xf32> to vector<8xf32>
    %81 = vector.shape_cast %80 : vector<8xf32> to vector<8x1xf32>
    %cst_25 = arith.constant 3.200000e+01 : f32
    %82 = vector.broadcast %cst_25 : f32 to vector<8x1xf32>
    %83 = arith.divf %81, %82 : vector<8x1xf32>
    %84 = vector.broadcast %83 : vector<8x1xf32> to vector<8x32xf32>
    %85 = arith.subf %79, %84 : vector<8x32xf32>
    %86 = arith.mulf %85, %85 : vector<8x32xf32>
    %cst_26 = arith.constant dense<0.000000e+00> : vector<8xf32>
    %87 = vector.multi_reduction <add>, %86, %cst_26 [1] : vector<8x32xf32> to vector<8xf32>
    %88 = vector.shape_cast %87 : vector<8xf32> to vector<8x1xf32>
    %cst_27 = arith.constant 3.200000e+01 : f32
    %89 = vector.broadcast %cst_27 : f32 to vector<8x1xf32>
    %90 = arith.divf %88, %89 : vector<8x1xf32>
    %91 = vector.broadcast %83 : vector<8x1xf32> to vector<8x32xf32>
    %92 = arith.subf %79, %91 : vector<8x32xf32>
    %cst_28 = arith.constant 9.99999996E-13 : f32
    %93 = vector.broadcast %cst_28 : f32 to vector<8x1xf32>
    %94 = arith.addf %90, %93 : vector<8x1xf32>
    %95 = math.rsqrt %94 : vector<8x1xf32>
    %96 = vector.broadcast %95 : vector<8x1xf32> to vector<8x32xf32>
    %97 = arith.mulf %92, %96 : vector<8x32xf32>
    %98 = vector.broadcast %17 : vector<1x32xf32> to vector<8x32xf32>
    %99 = arith.mulf %97, %98 : vector<8x32xf32>
    %100 = vector.broadcast %18 : vector<1x32xf32> to vector<8x32xf32>
    %101 = arith.addf %99, %100 : vector<8x32xf32>
    %cst_29 = arith.constant dense<0.000000e+00> : vector<8x64xf32>
    %102 = tpu.matmul %101, %23, %cst_29 {dimension_numbers = #tpu.dot_dimension_numbers<[1], [0], [0], [1], [0, 0, 1, 1], [], []>} : vector<8x32xf32>, vector<32x64xf32>, vector<8x64xf32> -> vector<8x64xf32>
    %103 = vector.broadcast %19 : vector<1x64xf32> to vector<8x64xf32>
    %104 = arith.addf %102, %103 : vector<8x64xf32>
    %105 = arith.mulf %104, %104 : vector<8x64xf32>
    %106 = arith.mulf %104, %105 : vector<8x64xf32>
    %cst_30 = arith.constant 4.471500e-02 : f32
    %107 = vector.broadcast %cst_30 : f32 to vector<8x64xf32>
    %108 = arith.mulf %107, %106 : vector<8x64xf32>
    %109 = arith.addf %104, %108 : vector<8x64xf32>
    %cst_31 = arith.constant 0.797884583 : f32
    %110 = vector.broadcast %cst_31 : f32 to vector<8x64xf32>
    %111 = arith.mulf %110, %109 : vector<8x64xf32>
    %112 = math.tanh %111 : vector<8x64xf32>
    %cst_32 = arith.constant 1.000000e+00 : f32
    %113 = vector.broadcast %cst_32 : f32 to vector<8x64xf32>
    %114 = arith.addf %113, %112 : vector<8x64xf32>
    %cst_33 = arith.constant 5.000000e-01 : f32
    %115 = vector.broadcast %cst_33 : f32 to vector<8x64xf32>
    %116 = arith.mulf %115, %114 : vector<8x64xf32>
    %117 = arith.mulf %104, %116 : vector<8x64xf32>
    %cst_34 = arith.constant dense<0.000000e+00> : vector<8x32xf32>
    %118 = tpu.matmul %117, %24, %cst_34 {dimension_numbers = #tpu.dot_dimension_numbers<[1], [1], [0], [0], [0, 0, 1, 0], [], []>} : vector<8x64xf32>, vector<32x64xf32>, vector<8x32xf32> -> vector<8x32xf32>
    %119 = vector.broadcast %20 : vector<1x32xf32> to vector<8x32xf32>
    %120 = arith.addf %118, %119 : vector<8x32xf32>
    %121 = arith.addf %79, %120 : vector<8x32xf32>
    %c1 = arith.constant 1 : index
    %c0_35 = arith.constant 0 : index
    %c0_36 = arith.constant 0 : index
    %122 = vector.load %arg4[%c1, %c0_35, %c0_36] : memref<2x32x256xf32, #tpu.memory_space<vmem>>, vector<1x32x256xf32>
    %123 = vector.shape_cast %122 : vector<1x32x256xf32> to vector<32x256xf32>
    %c1_37 = arith.constant 1 : index
    %c0_38 = arith.constant 0 : index
    %c0_39 = arith.constant 0 : index
    %124 = vector.load %arg5[%c1_37, %c0_38, %c0_39] : memref<2x8x96xf32, #tpu.memory_space<vmem>>, vector<1x8x96xf32>
    %125 = vector.shape_cast %124 : vector<1x8x96xf32> to vector<8x96xf32>
    %126 = vector.extract_strided_slice %125 {offsets = [0, 0], sizes = [1, 32], strides = [1, 1]} : vector<8x96xf32> to vector<1x32xf32>
    %127 = vector.extract_strided_slice %125 {offsets = [1, 0], sizes = [1, 32], strides = [1, 1]} : vector<8x96xf32> to vector<1x32xf32>
    %128 = vector.extract_strided_slice %125 {offsets = [2, 0], sizes = [1, 96], strides = [1, 1]} : vector<8x96xf32> to vector<1x96xf32>
    %129 = vector.extract_strided_slice %125 {offsets = [3, 0], sizes = [1, 32], strides = [1, 1]} : vector<8x96xf32> to vector<1x32xf32>
    %130 = vector.extract_strided_slice %125 {offsets = [4, 0], sizes = [1, 32], strides = [1, 1]} : vector<8x96xf32> to vector<1x32xf32>
    %131 = vector.extract_strided_slice %125 {offsets = [5, 0], sizes = [1, 32], strides = [1, 1]} : vector<8x96xf32> to vector<1x32xf32>
    %132 = vector.extract_strided_slice %125 {offsets = [6, 0], sizes = [1, 64], strides = [1, 1]} : vector<8x96xf32> to vector<1x64xf32>
    %133 = vector.extract_strided_slice %125 {offsets = [7, 0], sizes = [1, 32], strides = [1, 1]} : vector<8x96xf32> to vector<1x32xf32>
    %134 = vector.extract_strided_slice %123 {offsets = [0, 0], sizes = [32, 96], strides = [1, 1]} : vector<32x256xf32> to vector<32x96xf32>
    %135 = vector.extract_strided_slice %123 {offsets = [0, 96], sizes = [32, 32], strides = [1, 1]} : vector<32x256xf32> to vector<32x32xf32>
    %136 = vector.extract_strided_slice %123 {offsets = [0, 128], sizes = [32, 64], strides = [1, 1]} : vector<32x256xf32> to vector<32x64xf32>
    %137 = vector.extract_strided_slice %123 {offsets = [0, 192], sizes = [32, 64], strides = [1, 1]} : vector<32x256xf32> to vector<32x64xf32>
    %cst_40 = arith.constant dense<0.000000e+00> : vector<8xf32>
    %138 = vector.multi_reduction <add>, %121, %cst_40 [1] : vector<8x32xf32> to vector<8xf32>
    %139 = vector.shape_cast %138 : vector<8xf32> to vector<8x1xf32>
    %cst_41 = arith.constant 3.200000e+01 : f32
    %140 = vector.broadcast %cst_41 : f32 to vector<8x1xf32>
    %141 = arith.divf %139, %140 : vector<8x1xf32>
    %142 = vector.broadcast %141 : vector<8x1xf32> to vector<8x32xf32>
    %143 = arith.subf %121, %142 : vector<8x32xf32>
    %144 = arith.mulf %143, %143 : vector<8x32xf32>
    %cst_42 = arith.constant dense<0.000000e+00> : vector<8xf32>
    %145 = vector.multi_reduction <add>, %144, %cst_42 [1] : vector<8x32xf32> to vector<8xf32>
    %146 = vector.shape_cast %145 : vector<8xf32> to vector<8x1xf32>
    %cst_43 = arith.constant 3.200000e+01 : f32
    %147 = vector.broadcast %cst_43 : f32 to vector<8x1xf32>
    %148 = arith.divf %146, %147 : vector<8x1xf32>
    %149 = vector.broadcast %141 : vector<8x1xf32> to vector<8x32xf32>
    %150 = arith.subf %121, %149 : vector<8x32xf32>
    %cst_44 = arith.constant 9.99999996E-13 : f32
    %151 = vector.broadcast %cst_44 : f32 to vector<8x1xf32>
    %152 = arith.addf %148, %151 : vector<8x1xf32>
    %153 = math.rsqrt %152 : vector<8x1xf32>
    %154 = vector.broadcast %153 : vector<8x1xf32> to vector<8x32xf32>
    %155 = arith.mulf %150, %154 : vector<8x32xf32>
    %156 = vector.broadcast %126 : vector<1x32xf32> to vector<8x32xf32>
    %157 = arith.mulf %155, %156 : vector<8x32xf32>
    %158 = vector.broadcast %127 : vector<1x32xf32> to vector<8x32xf32>
    %159 = arith.addf %157, %158 : vector<8x32xf32>
    %cst_45 = arith.constant dense<0.000000e+00> : vector<8x96xf32>
    %160 = tpu.matmul %159, %134, %cst_45 {dimension_numbers = #tpu.dot_dimension_numbers<[1], [0], [0], [1], [0, 0, 1, 1], [], []>} : vector<8x32xf32>, vector<32x96xf32>, vector<8x96xf32> -> vector<8x96xf32>
    %161 = vector.broadcast %128 : vector<1x96xf32> to vector<8x96xf32>
    %162 = arith.addf %160, %161 : vector<8x96xf32>
    %163 = vector.extract_strided_slice %162 {offsets = [0, 0], sizes = [8, 32], strides = [1, 1]} : vector<8x96xf32> to vector<8x32xf32>
    %164 = vector.shape_cast %163 : vector<8x32xf32> to vector<8x4x8xf32>
    %165 = tpu.transpose %164, [1, 0, 2] : vector<8x4x8xf32> -> vector<4x8x8xf32>
    %166 = vector.extract_strided_slice %162 {offsets = [0, 32], sizes = [8, 32], strides = [1, 1]} : vector<8x96xf32> to vector<8x32xf32>
    %167 = vector.shape_cast %166 : vector<8x32xf32> to vector<8x4x8xf32>
    %168 = tpu.transpose %167, [1, 0, 2] : vector<8x4x8xf32> -> vector<4x8x8xf32>
    %169 = vector.extract_strided_slice %162 {offsets = [0, 64], sizes = [8, 32], strides = [1, 1]} : vector<8x96xf32> to vector<8x32xf32>
    %170 = vector.shape_cast %169 : vector<8x32xf32> to vector<8x4x8xf32>
    %171 = tpu.transpose %170, [1, 0, 2] : vector<8x4x8xf32> -> vector<4x8x8xf32>
    "tpu.trace_start"() <{level = 10 : i32, message = "htd,hsd->hts"}> : () -> ()
    %cst_46 = arith.constant dense<0.000000e+00> : vector<4x8x8xf32>
    %172 = tpu.matmul %165, %168, %cst_46 {dimension_numbers = #tpu.dot_dimension_numbers<[2], [2], [1], [1], [0, 0, 0, 1, 1, 1], [0], [0]>} : vector<4x8x8xf32>, vector<4x8x8xf32>, vector<4x8x8xf32> -> vector<4x8x8xf32>
    %cst_47 = arith.constant -1.000000e+30 : f32
    "tpu.trace_stop"() : () -> ()
    %173 = vector.shape_cast %8 : vector<1x1x8xi1> to vector<1x1x8xi1>
    %174 = vector.broadcast %173 : vector<1x1x8xi1> to vector<4x8x8xi1>
    %175 = vector.broadcast %cst_47 : f32 to vector<4x8x8xf32>
    %176 = arith.select %174, %172, %175 : vector<4x8x8xi1>, vector<4x8x8xf32>
    %cst_48 = arith.constant dense<0xFF800000> : vector<4x8xf32>
    %177 = vector.multi_reduction <maximumf>, %176, %cst_48 [2] : vector<4x8x8xf32> to vector<4x8xf32>
    %178 = vector.shape_cast %177 : vector<4x8xf32> to vector<4x8x1xf32>
    %179 = vector.broadcast %178 : vector<4x8x1xf32> to vector<4x8x8xf32>
    %180 = arith.subf %176, %179 : vector<4x8x8xf32>
    %181 = math.exp %180 : vector<4x8x8xf32>
    %cst_49 = arith.constant dense<0.000000e+00> : vector<4x8xf32>
    %182 = vector.multi_reduction <add>, %181, %cst_49 [2] : vector<4x8x8xf32> to vector<4x8xf32>
    %183 = vector.shape_cast %182 : vector<4x8xf32> to vector<4x8x1xf32>
    %184 = vector.broadcast %183 : vector<4x8x1xf32> to vector<4x8x8xf32>
    %185 = arith.divf %181, %184 : vector<4x8x8xf32>
    "tpu.trace_start"() <{level = 10 : i32, message = "hts,hsd->htd"}> : () -> ()
    %cst_50 = arith.constant dense<0.000000e+00> : vector<4x8x8xf32>
    %186 = tpu.matmul %185, %171, %cst_50 {dimension_numbers = #tpu.dot_dimension_numbers<[2], [1], [1], [2], [0, 0, 0, 1, 1, 2], [0], [0]>} : vector<4x8x8xf32>, vector<4x8x8xf32>, vector<4x8x8xf32> -> vector<4x8x8xf32>
    "tpu.trace_stop"() : () -> ()
    %187 = tpu.transpose %186, [1, 0, 2] : vector<4x8x8xf32> -> vector<8x4x8xf32>
    %188 = vector.shape_cast %187 : vector<8x4x8xf32> to vector<8x32xf32>
    %cst_51 = arith.constant dense<0.000000e+00> : vector<8x32xf32>
    %189 = tpu.matmul %188, %135, %cst_51 {dimension_numbers = #tpu.dot_dimension_numbers<[1], [0], [0], [1], [0, 0, 1, 1], [], []>} : vector<8x32xf32>, vector<32x32xf32>, vector<8x32xf32> -> vector<8x32xf32>
    %190 = vector.broadcast %129 : vector<1x32xf32> to vector<8x32xf32>
    %191 = arith.addf %189, %190 : vector<8x32xf32>
    %192 = arith.addf %121, %191 : vector<8x32xf32>
    %cst_52 = arith.constant dense<0.000000e+00> : vector<8xf32>
    %193 = vector.multi_reduction <add>, %192, %cst_52 [1] : vector<8x32xf32> to vector<8xf32>
    %194 = vector.shape_cast %193 : vector<8xf32> to vector<8x1xf32>
    %cst_53 = arith.constant 3.200000e+01 : f32
    %195 = vector.broadcast %cst_53 : f32 to vector<8x1xf32>
    %196 = arith.divf %194, %195 : vector<8x1xf32>
    %197 = vector.broadcast %196 : vector<8x1xf32> to vector<8x32xf32>
    %198 = arith.subf %192, %197 : vector<8x32xf32>
    %199 = arith.mulf %198, %198 : vector<8x32xf32>
    %cst_54 = arith.constant dense<0.000000e+00> : vector<8xf32>
    %200 = vector.multi_reduction <add>, %199, %cst_54 [1] : vector<8x32xf32> to vector<8xf32>
    %201 = vector.shape_cast %200 : vector<8xf32> to vector<8x1xf32>
    %cst_55 = arith.constant 3.200000e+01 : f32
    %202 = vector.broadcast %cst_55 : f32 to vector<8x1xf32>
    %203 = arith.divf %201, %202 : vector<8x1xf32>
    %204 = vector.broadcast %196 : vector<8x1xf32> to vector<8x32xf32>
    %205 = arith.subf %192, %204 : vector<8x32xf32>
    %cst_56 = arith.constant 9.99999996E-13 : f32
    %206 = vector.broadcast %cst_56 : f32 to vector<8x1xf32>
    %207 = arith.addf %203, %206 : vector<8x1xf32>
    %208 = math.rsqrt %207 : vector<8x1xf32>
    %209 = vector.broadcast %208 : vector<8x1xf32> to vector<8x32xf32>
    %210 = arith.mulf %205, %209 : vector<8x32xf32>
    %211 = vector.broadcast %130 : vector<1x32xf32> to vector<8x32xf32>
    %212 = arith.mulf %210, %211 : vector<8x32xf32>
    %213 = vector.broadcast %131 : vector<1x32xf32> to vector<8x32xf32>
    %214 = arith.addf %212, %213 : vector<8x32xf32>
    %cst_57 = arith.constant dense<0.000000e+00> : vector<8x64xf32>
    %215 = tpu.matmul %214, %136, %cst_57 {dimension_numbers = #tpu.dot_dimension_numbers<[1], [0], [0], [1], [0, 0, 1, 1], [], []>} : vector<8x32xf32>, vector<32x64xf32>, vector<8x64xf32> -> vector<8x64xf32>
    %216 = vector.broadcast %132 : vector<1x64xf32> to vector<8x64xf32>
    %217 = arith.addf %215, %216 : vector<8x64xf32>
    %218 = arith.mulf %217, %217 : vector<8x64xf32>
    %219 = arith.mulf %217, %218 : vector<8x64xf32>
    %cst_58 = arith.constant 4.471500e-02 : f32
    %220 = vector.broadcast %cst_58 : f32 to vector<8x64xf32>
    %221 = arith.mulf %220, %219 : vector<8x64xf32>
    %222 = arith.addf %217, %221 : vector<8x64xf32>
    %cst_59 = arith.constant 0.797884583 : f32
    %223 = vector.broadcast %cst_59 : f32 to vector<8x64xf32>
    %224 = arith.mulf %223, %222 : vector<8x64xf32>
    %225 = math.tanh %224 : vector<8x64xf32>
    %cst_60 = arith.constant 1.000000e+00 : f32
    %226 = vector.broadcast %cst_60 : f32 to vector<8x64xf32>
    %227 = arith.addf %226, %225 : vector<8x64xf32>
    %cst_61 = arith.constant 5.000000e-01 : f32
    %228 = vector.broadcast %cst_61 : f32 to vector<8x64xf32>
    %229 = arith.mulf %228, %227 : vector<8x64xf32>
    %230 = arith.mulf %217, %229 : vector<8x64xf32>
    %cst_62 = arith.constant dense<0.000000e+00> : vector<8x32xf32>
    %231 = tpu.matmul %230, %137, %cst_62 {dimension_numbers = #tpu.dot_dimension_numbers<[1], [1], [0], [0], [0, 0, 1, 0], [], []>} : vector<8x64xf32>, vector<32x64xf32>, vector<8x32xf32> -> vector<8x32xf32>
    %232 = vector.broadcast %133 : vector<1x32xf32> to vector<8x32xf32>
    %233 = arith.addf %231, %232 : vector<8x32xf32>
    %234 = arith.addf %192, %233 : vector<8x32xf32>
    %235 = vector.extract_strided_slice %234 {offsets = [0, 0], sizes = [1, 32], strides = [1, 1]} : vector<8x32xf32> to vector<1x32xf32>
    %c8 = arith.constant 8 : index
    %c0_63 = arith.constant 0 : index
    %236 = vector.load %arg3[%c8, %c0_63] : memref<10x32xf32, #tpu.memory_space<vmem>>, vector<1x32xf32>
    %c9 = arith.constant 9 : index
    %c0_64 = arith.constant 0 : index
    %237 = vector.load %arg3[%c9, %c0_64] : memref<10x32xf32, #tpu.memory_space<vmem>>, vector<1x32xf32>
    %cst_65 = arith.constant dense<0.000000e+00> : vector<1xf32>
    %238 = vector.multi_reduction <add>, %235, %cst_65 [1] : vector<1x32xf32> to vector<1xf32>
    %239 = vector.shape_cast %238 : vector<1xf32> to vector<1x1xf32>
    %cst_66 = arith.constant 3.200000e+01 : f32
    %240 = vector.broadcast %cst_66 : f32 to vector<1x1xf32>
    %241 = arith.divf %239, %240 : vector<1x1xf32>
    %242 = vector.broadcast %241 : vector<1x1xf32> to vector<1x32xf32>
    %243 = arith.subf %235, %242 : vector<1x32xf32>
    %244 = arith.mulf %243, %243 : vector<1x32xf32>
    %cst_67 = arith.constant dense<0.000000e+00> : vector<1xf32>
    %245 = vector.multi_reduction <add>, %244, %cst_67 [1] : vector<1x32xf32> to vector<1xf32>
    %246 = vector.shape_cast %245 : vector<1xf32> to vector<1x1xf32>
    %cst_68 = arith.constant 3.200000e+01 : f32
    %247 = vector.broadcast %cst_68 : f32 to vector<1x1xf32>
    %248 = arith.divf %246, %247 : vector<1x1xf32>
    %249 = vector.broadcast %241 : vector<1x1xf32> to vector<1x32xf32>
    %250 = arith.subf %235, %249 : vector<1x32xf32>
    %cst_69 = arith.constant 9.99999996E-13 : f32
    %251 = vector.broadcast %cst_69 : f32 to vector<1x1xf32>
    %252 = arith.addf %248, %251 : vector<1x1xf32>
    %253 = math.rsqrt %252 : vector<1x1xf32>
    %254 = vector.broadcast %253 : vector<1x1xf32> to vector<1x32xf32>
    %255 = arith.mulf %250, %254 : vector<1x32xf32>
    %256 = arith.mulf %255, %236 : vector<1x32xf32>
    %257 = arith.addf %256, %237 : vector<1x32xf32>
    %258 = vector.shape_cast %257 : vector<1x32xf32> to vector<1x1x32xf32>
    %c0_70 = arith.constant 0 : index
    %c0_71 = arith.constant 0 : index
    %c0_72 = arith.constant 0 : index
    %259 = vector.load %arg6[%c0_70, %c0_71, %c0_72] : memref<1x1x32xf32, #tpu.memory_space<vmem>>, vector<1x1x32xf32>
    tpu.vector_store %arg6[%c0_70, %c0_71, %c0_72], %258 {strides = array<i32>} : memref<1x1x32xf32, #tpu.memory_space<vmem>>, vector<1x1x32xf32>,
    return
  }
  func.func @transform_0(%arg0: i32) -> (i32, i32, i32) {
    %c0_i32 = arith.constant 0 : i32
    %c0_i32_0 = arith.constant 0 : i32
    %c0_i32_1 = arith.constant 0 : i32
    return %arg0, %c0_i32, %c0_i32_0 : i32, i32, i32
  }
  func.func @transform_1(%arg0: i32) -> (i32, i32) {
    %c0_i32 = arith.constant 0 : i32
    %c0_i32_0 = arith.constant 0 : i32
    %c0_i32_1 = arith.constant 0 : i32
    return %c0_i32, %c0_i32_0 : i32, i32
  }
  func.func @transform_2(%arg0: i32) -> (i32, i32) {
    %c0_i32 = arith.constant 0 : i32
    %c0_i32_0 = arith.constant 0 : i32
    %c0_i32_1 = arith.constant 0 : i32
    return %c0_i32, %c0_i32_0 : i32, i32
  }
  func.func @transform_3(%arg0: i32) -> (i32, i32, i32) {
    %c0_i32 = arith.constant 0 : i32
    %c0_i32_0 = arith.constant 0 : i32
    %c0_i32_1 = arith.constant 0 : i32
    %c0_i32_2 = arith.constant 0 : i32
    return %c0_i32, %c0_i32_0, %c0_i32_1 : i32, i32, i32
  }
  func.func @transform_4(%arg0: i32) -> (i32, i32, i32) {
    %c0_i32 = arith.constant 0 : i32
    %c0_i32_0 = arith.constant 0 : i32
    %c0_i32_1 = arith.constant 0 : i32
    %c0_i32_2 = arith.constant 0 : i32
    return %c0_i32, %c0_i32_0, %c0_i32_1 : i32, i32, i32
  }
  func.func @transform_5(%arg0: i32) -> (i32, i32, i32) {
    %c0_i32 = arith.constant 0 : i32
    %c0_i32_0 = arith.constant 0 : i32
    %c0_i32_1 = arith.constant 0 : i32
    return %arg0, %c0_i32, %c0_i32_0 : i32, i32, i32
  }
}

</mosaic_0001>

<bundles_post_ra>
// kernel: simple_vit_forward.1
= control target key start
LH: loop header
LB: loop body
LE: loop exit
PB: predicated region body
PF: predicated region fallthrough
CT: control target
= control target key end

     0   :  { %10 = vsyncpa [#allocation3], 0  ;;  %s5051_s0 = inlined_call_operand.vmem [shape: f32[2,8,192], index: 0, kind: input, shape index: {}]   ;;  %s5052_s1 = inlined_call_operand.vmem [shape: f32[192,32], index: 1, kind: input, shape index: {}]   ;;  %s5053_s2 = inlined_call_operand.vmem [shape: f32[10,32], index: 2, kind: input, shape index: {}]   ;;  %s5054_s3 = inlined_call_operand.vmem [shape: f32[2,32,256], index: 3, kind: input, shape index: {}]   ;;  %s5055_s4 = inlined_call_operand.vmem [shape: f32[2,8,96], index: 4, kind: input, shape index: {}]   ;;  %s5056_s5 = inlined_call_operand.hbm [shape: f32[2,1,32], index: 5, kind: output, shape index: {}]  }
   0x1   :  { %12 = vsyncpa [#allocation3 + $0x1], 0  ;;  %s4236_s18 = smov 0   ;;  %s4238_s19 = smov 0  }
   0x2   :  { %s4240_s20 = smov 0   ;;  %s4242_s21 = smov 0  }
   0x3 LB: > { %s4257_s22 = sadd.s32 4294967295, %s4190_s21   ;;  %s3716_s23 = sadd.s32 4294967294, %s4190_s21   ;;  %s4190_s21 = sphi %s4242_s21, %s5062_s21   ;;  %s4186_s20 = sphi %s4240_s20, %s5061_s20   ;;  %s4182_s19 = sphi %s4238_s19, %s5060_s19   ;;  %s4178_s18 = sphi %s4236_s18, %s5059_s18  }
   0x4   : > { %s4261_s24 = sadd.s32 1, %s4190_s21   ;;  %s135_s25 = sadd.s32 1, %s4186_s20 }
   0x5   : > { %s132_s26 = ssub.s32 %s4190_s21, %s4261_s24  ;;  %p145_p0 = scmp.ne.s32.totalorder %s4186_s20, %s4182_s19 }
   0x6   : > { %p133_p1 = scmp.eq.s32.totalorder %s132_s26, 0  ;;  %p146_p2 = scmp.eq.s32.totalorder %s4257_s22, 1 }
   0x7   : > { %p151_p3 = scmp.ne.s32.totalorder %s4182_s19, %s4178_s18  ;;  %p152_p4 = scmp.eq.s32.totalorder %s3716_s23, 1 }
   0x8   : > { %s4272_s27 = scalar_select %p133_p1, %s4186_s20, %s135_s25  }
   0x9   : > { %p4274_p5 = por %p146_p2, %p145_p0  ;;  %p4278_p6 = por %p152_p4, %p151_p3 }
   0xa   : > { %p3719_p7 = scmp.ge.s32.totalorder %s4190_s21, 1  ;;  %p190_p8 = scmp.lt.s32.totalorder %s4190_s21, 3 }
   0xc   : > { %p191_p9 = pnand %p3719_p7, %p190_p8 }
   0xd   : > { %p217_p10 = scmp.lt.s32.totalorder (!%p191_p9), %s4257_s22, 1  ;;  %s4194_s8 = smov (!%p191_p9), 104  }
   0xe   : > { %194 = sbr.rel (%p191_p9) target bundleno = 5724 (0x165c), region = 40  ;;  %s4196_s10 = smov (!%p191_p9), 112  }
   0xf   : > { %s4197_s11 = smov (!%p191_p9), 96   ;;  %s4201_s13 = smov (!%p191_p9), 32  }
  0x10   : > { %s4203_s14 = smov (!%p191_p9), 16   ;;  %s4204_s15 = smov (!%p191_p9), 24  }
  0x11   : > { %s3788_s23 = sshll.u32 (!%p191_p9), %s4257_s22, 4 }
  0x13   : > { %v239_v0 = vld [vmem:[%s5052_s1 + $0x78] sm:$0xff]  ;;  %v4192_v1 = vmov 0.0   ;;  %v238_v2 = vld [vmem:[%s5052_s1 + $0x70] sm:$0xff]  ;;  %s218_s9 = scalar_select %p217_p10, %s4257_s22, 1  ;;  %v237_v3 = vld [vmem:[%s5052_s1 + $0x68] sm:$0xff]  ;;  %vm249_vm0 = vcmask 523264   ;;  %v323_v44 = vlaneseq }
  0x14   : > { %253 = vmatprep.subr.mxu0 %v4192_v1  ;;  %3864 = vmatprep.subr.mxu1 %v4192_v1  ;;  %v236_v4 = vld [vmem:[%s5052_s1 + $0x60] sm:$0xff]  ;;  %v235_v5 = vld [vmem:[%s5052_s1 + $0x58] sm:$0xff]  ;;  %v234_v7 = vld [vmem:[%s5052_s1 + $0x50] sm:$0xff]  ;;  %vm335_vm1 = vcmask 261120   ;;  %vm4193_vm2 = vmmov 0   ;;  %vm879_vm3 = vcmask 64512  }
  0x15   : > { %254 = vmatpush1.msra.mxu0 %v239_v0  ;;  %s3791_s12 = sshll.u32 %s218_s9, 4  ;;  %v233_v8 = vld [vmem:[%s5052_s1 + $0x48] sm:$0xff]  ;;  %v232_v9 = vld [vmem:[%s5052_s1 + $0x40] sm:$0xff]  ;;  %v231_v10 = vld [vmem:[%s5052_s1 + $0x38] sm:$0xff]  ;;  %3872 = vmatprep.mubr.msk.f32.mxu1 %vm4193_vm2, %v4192_v1  ;;  %v4434_v45 = vshrl.u32 %v323_v44, 7  ;;  %s4195_s9 = smov 120  }
  0x16   : > { %255 = vmatprep.subr.mxu0 %v4192_v1  ;;  %s4305_s17 = scalar_lea.vmem %s5051_s0, %s3791_s12  ;;  %v230_v11 = vld [vmem:[%s5052_s1 + $0x30] sm:$0xff]  ;;  %v229_v12 = vld [vmem:[%s5052_s1 + $0x28] sm:$0xff]  ;;  %v228_v13 = vld [vmem:[%s5052_s1 + $0x20] sm:$0xff]  ;;  %v4198_v63 = vmov 1983009808   ;;  %s4200_s12 = smov 64  }
  0x17   : > { %256 = vmatpush1.msra.mxu0 %v238_v2  ;;  %v223_v6 = vld [vmem:[%s4305_s17 + $0x8] sm:$0xff]  ;;  %v227_v14 = vld [vmem:[%s5052_s1 + $0x18] sm:$0xff]  ;;  %v226_v15 = vld [vmem:[%s5052_s1 + $0x10] sm:$0xff]  ;;  %v352_v46 = vsub.s32 0, %v4434_v45  ;;  %v357_v48 = vsub.s32 1, %v4434_v45  ;;  %v362_v55 = vsub.s32 2, %v4434_v45  ;;  %v450_v0 = vunpack.c.l.s4 %v4198_v63 }
  0x18   : > { %257 = vmatprep.subr.mxu0 %v4192_v1  ;;  %3722 = vmatprep.mubr.msk.f32.mxu0 %vm249_vm0, %v223_v6  ;;  %v225_v16 = vld [vmem:[%s5052_s1 + $0x8] sm:$0xff]  ;;  %v224_v17 = vld [vmem:[%s5052_s1] sm:$0xff]  ;;  %v247_v18 = vld [vmem:[%s5052_s1 + $0xb8] sm:$0xff]  ;;  %vm1675_vm5 = vcmask 130048   ;;  %vm1677_vm6 = vcmask 195584   ;;  %vm3631_vm7 = vcmask 253952  }
  0x19   : > { %258 = vmatpush1.msra.mxu0 %v237_v3  ;;  %v246_v19 = vld [vmem:[%s5052_s1 + $0xb0] sm:$0xff]  ;;  %v245_v20 = vld [vmem:[%s5052_s1 + $0xa8] sm:$0xff]  ;;  %v244_v21 = vld [vmem:[%s5052_s1 + $0xa0] sm:$0xff]  ;;  %v451_v2 = vunpack.c.0.s8 %v450_v0  ;;  %v4199_v3 = vmov 1934713408  }
  0x1a   : > { %259 = vmatprep.subr.mxu0 %v4192_v1  ;;  %v243_v22 = vld [vmem:[%s5052_s1 + $0x98] sm:$0xff]  ;;  %v242_v23 = vld [vmem:[%s5052_s1 + $0x90] sm:$0xff]  ;;  %v241_v24 = vld [vmem:[%s5052_s1 + $0x88] sm:$0xff] }
  0x1b   : > { %260 = vmatpush1.msra.mxu0 %v236_v4  ;;  %v240_v25 = vld [vmem:[%s5052_s1 + $0x80] sm:$0xff]  ;;  %v4404_v37 = vld [vmem:[%s5054_s3 + $0x30] sm:$0xff]  ;;  %v482_v4 = vunpack.c.l.s4 %v4199_v3 }
  0x1c   : > { %261 = vmatprep.subr.mxu0 %v4192_v1  ;;  %v222_v26 = vld [vmem:[%s4305_s17] sm:$0xff]  ;;  %3865 = vmatpush3.msra.mxu1 %v4404_v37  ;;  %v4418_v39 = vld [vmem:[%s5054_s3 + $0x10] sm:$0xff]  ;;  %s4202_s17 = smov 8  }
  0x1d   : > { %262 = vmatpush1.msra.mxu0 %v235_v5  ;;  %v248_v27 = vld [vmem:[%s5053_s2] sm:$0xff]  ;;  %3866 = vmatprep.subr.mxu1 %v4192_v1 }
  0x1e   : > { %263 = vmatprep.subr.mxu0 %v4192_v1  ;;  %v4409_v38 = vld [vmem:[%s5054_s3 + $0x20] sm:$0xff] }
  0x1f   : > { %264 = vmatpush1.msra.mxu0 %v234_v7  ;;  %3867 = vmatpush3.msra.mxu1 %v4409_v38  ;;  %v4427_v40 = vld [vmem:[%s5054_s3] sm:$0xff] }
  0x20   : > { %265 = vmatprep.subr.mxu0 %v4192_v1  ;;  %3868 = vmatprep.subr.mxu1 %v4192_v1  ;;  %v4440_v47 = vld [vmem:[%s5055_s4] sm:$0xff] }
  0x21   : > { %266 = vmatpush1.msra.mxu0 %v233_v8  ;;  %3869 = vmatpush3.msra.mxu1 %v4418_v39  ;;  %v353_v49 = vrot.slane %v4440_v47, %v352_v46  ;;  %v358_v52 = vrot.slane %v4440_v47, %v357_v48  ;;  %v363_v56 = vrot.slane %v4440_v47, %v362_v55 }
  0x22   : > { %267 = vmatprep.subr.mxu0 %v4192_v1  ;;  %3870 = vmatprep.subr.mxu1 %v4192_v1  ;;  %v4483_v8 = vsub.s32 %v451_v2, %v4434_v45 }
  0x23   : > { %268 = vmatpush1.msra.mxu0 %v232_v9  ;;  %3871 = vmatpush3.msra.mxu1 %v4427_v40 }
  0x24   : > { %269 = vmatprep.subr.mxu0 %v4192_v1  ;;  %3875 = vmatprep.subr.mxu1 %v4192_v1 }
  0x25   : > { %270 = vmatpush1.msra.mxu0 %v231_v10 }
  0x26   : > { %271 = vmatprep.subr.mxu0 %v4192_v1 }
  0x27   : > { %272 = vmatpush1.msra.mxu0 %v230_v11  ;;  %v483_v11 = vunpack.c.0.s8 %v482_v4 }
  0x28   : > { %273 = vmatprep.subr.mxu0 %v4192_v1 }
  0x29   : > { %274 = vmatpush1.msra.mxu0 %v229_v12 }
  0x2a   : > { %275 = vmatprep.subr.mxu0 %v4192_v1 }
  0x2b   : > { %276 = vmatpush1.msra.mxu0 %v228_v13 }
  0x2c   : > { %277 = vmatprep.subr.mxu0 %v4192_v1 }
  0x2d   : > { %278 = vmatpush1.msra.mxu0 %v227_v14 }
  0x2e   : > { %279 = vmatprep.subr.mxu0 %v4192_v1 }
  0x2f   : > { %280 = vmatpush1.msra.mxu0 %v226_v15 }
  0x30   : > { %281 = vmatprep.subr.mxu0 %v4192_v1 }
  0x31   : > { %282 = vmatpush1.msra.mxu0 %v225_v16 }
  0x32   : > { %283 = vmatprep.subr.mxu0 %v4192_v1 }
  0x33   : > { %284 = vmatpush1.msra.mxu0 %v224_v17  ;;  %v4494_v17 = vsub.s32 %v483_v11, %v4434_v45 }
  0x34   : > { %301 = vmatprep.subr.mxu0 %v4192_v1 }
  0x35   : > { %302 = vmatpush2.msra.mxu0 %v247_v18 }
  0x36   : > { %303 = vmatprep.subr.mxu0 %v4192_v1 }
  0x37   : > { %304 = vmatpush2.msra.mxu0 %v246_v19 }
  0x38   : > { %305 = vmatprep.subr.mxu0 %v4192_v1 }
  0x39   : > { %306 = vmatpush2.msra.mxu0 %v245_v20 }
  0x3a   : > { %307 = vmatprep.subr.mxu0 %v4192_v1 }
  0x3b   : > { %308 = vmatpush2.msra.mxu0 %v244_v21 }
  0x3c   : > { %309 = vmatprep.subr.mxu0 %v4192_v1 }
  0x3d   : > { %310 = vmatpush2.msra.mxu0 %v243_v22 }
  0x3e   : > { %311 = vmatprep.subr.mxu0 %v4192_v1 }
  0x3f   : > { %312 = vmatpush2.msra.mxu0 %v242_v23 }
  0x40   : > { %313 = vmatprep.subr.mxu0 %v4192_v1 }
  0x41   : > { %314 = vmatpush2.msra.mxu0 %v241_v24 }
  0x42   : > { %315 = vmatprep.subr.mxu0 %v4192_v1 }
  0x43   : > { %316 = vmatpush2.msra.mxu0 %v240_v25 }
  0x44   : > { %318 = vmatmul.mubr.f32.vlgmr.msra.gmra.mxu0 %v222_v26  ;;  %3948 = vmatprep.subr.mxu0 %v4192_v1 }
  0x45   : > { %3956 = vmatprep.mubr.msk.f32.mxu0 %vm4193_vm2, %v4192_v1 }
 0x104   : > { %v319_v28 = vpop.f32.mrf.mxu0 }
 0x105   : > { %v4395_v29 = vadd.f32 %v319_v28, %v248_v27 }
 0x106   : > { %v321_v30 = vpop.f32.mrf.mxu0 }
 0x107   : > { %v336_v31 = vsel %vm335_vm1, %v4395_v29, 0.0 }
 0x108   : > { %337 = vadd.xlane.f32.xlu0 %v336_v31 }
 0x191   : > { %v338_v32 = vpop.xlane.xlu0 %337 }
 0x192   : > { %v340_v33 = vmul.f32 0.03125, %v338_v32 }
 0x194   : > { %v341_v34 = vsub.f32 %v4395_v29, %v340_v33 }
 0x196   : > { %v342_v35 = vmul.f32 %v341_v34, %v341_v34 }
 0x198   : > { %v343_v36 = vsel %vm335_vm1, %v342_v35, 0.0 }
 0x199   : > { %344 = vadd.xlane.f32.xlu0 %v343_v36 }
 0x222   : > { %v345_v41 = vpop.xlane.xlu0 %344 }
 0x223   : > { %v346_v42 = vmul.f32 0.03125, %v345_v41 }
 0x225   : > { %v347_v43 = vadd.f32 1e-12, %v346_v42 }
 0x227   : > { %4084 = vrsqrt.f32 %v347_v43 }
 0x234   : > { %v4085_v50 = vpop.eup %4084 }
 0x235   : > { %v349_v51 = vmul.f32 %v4085_v50, %v341_v34 }
 0x237   : > { %v354_v53 = vmul.f32 %v353_v49, %v349_v51 }
 0x239   : > { %v359_v54 = vadd.f32 %v358_v52, %v354_v53 }
 0x23b   : > { %3873 = vmatmul.mubr.msk.f32.vlgmr.msra.gmra.mxu1 %vm335_vm1, %v359_v54 }
 0x23c   : > { %3877 = vmatprep.mubr.msk.f32.mxu1 %vm4193_vm2, %v4192_v1 }
 0x2fb   : > { %v433_v57 = vpop.f32.mrf.mxu1 }
 0x2fc   : > { %v4456_v58 = vadd.f32 %v433_v57, %v363_v56 }
 0x2fd   : > { %v3874_v59 = vpop.f32.mrf.mxu1 }
 0x2fe   : > { %444 = vrot.lane.b32.xlu0 %v4456_v58, %s4194_s8  ;;  %438 = vrot.lane.b32.xlu1 %v4456_v58, %s4195_s9 }
 0x302   : > { %441 = vrot.lane.b32.xlu1 %v4456_v58, %s4196_s10 }
 0x306   : > { %583 = vrot.lane.b32.xlu1 %v4456_v58, %s4197_s11 }
 0x370   : > { %v4466_v60 = vpop.permute.xlu1 %438  ;;  %v4474_v62 = vpop.permute.xlu0 %444 }
 0x371   : > { %585 = vrot.lane.b32.xlu1 %v4466_v60, %s4197_s11  ;;  %v463_v9 = vcombine.low %v4466_v60, %v4474_v62  ;;  %v464_v10 = vcombine.high %v4466_v60, %v4474_v62 }
 0x373   : > { %v471_v15 = vrot.slane %v463_v9, %v4483_v8  ;;  %v478_v16 = vrot.slane %v464_v10, %v4483_v8 }
 0x374   : > { %v4470_v61 = vpop.permute.xlu1 %441 }
 0x375   : > { %587 = vrot.lane.b32.xlu1 %v4470_v61, %s4197_s11  ;;  %v447_v5 = vcombine.low %v4456_v58, %v4470_v61  ;;  %v448_v6 = vcombine.high %v4456_v58, %v4470_v61 }
 0x377   : > { %v455_v12 = vrot.slane %v447_v5, %v4483_v8  ;;  %v462_v13 = vrot.slane %v448_v6, %v4483_v8 }
 0x378   : > { %v584_v7 = vpop.permute.xlu1 %583 }
 0x379   : > { %589 = vrot.lane.b32.xlu1 %v4474_v62, %s4197_s11  ;;  %v479_v18 = vcombine.low %v455_v12, %v471_v15  ;;  %v480_v19 = vcombine.high %v455_v12, %v471_v15  ;;  %v495_v20 = vcombine.low %v462_v13, %v478_v16  ;;  %v496_v21 = vcombine.high %v462_v13, %v478_v16 }
 0x37b   : > { %v487_v25 = vrot.slane %v479_v18, %v4494_v17  ;;  %v494_v26 = vrot.slane %v480_v19, %v4494_v17  ;;  %v503_v27 = vrot.slane %v495_v20, %v4494_v17  ;;  %v510_v28 = vrot.slane %v496_v21, %v4494_v17 }
 0x37d   : > { %v515_v41 = vcombine.low %v487_v25, %v494_v26  ;;  %v3724_v42 = vcombine.high %v487_v25, %v494_v26  ;;  %v531_v43 = vcombine.low %v503_v27, %v510_v28  ;;  %v3725_v49 = vcombine.high %v503_v27, %v510_v28 }
 0x37f   : > { %v522_v63 = vrot.slane %v515_v41, %v4483_v8  ;;  %v530_v0 = vrot.slane %v3724_v42, %v4483_v8  ;;  %v538_v2 = vrot.slane %v531_v43, %v4483_v8  ;;  %v546_v3 = vrot.slane %v3725_v49, %v4483_v8 }
 0x380   : > { %v4545_v43 = vand.u32 127, %v323_v44 }
 0x381   : > { %v547_v13 = vcombine.low %v522_v63, %v530_v0  ;;  %v548_v26 = vcombine.high %v522_v63, %v530_v0  ;;  %v564_v27 = vcombine.high %v538_v2, %v546_v3 }
 0x382   : > { %vm325_vm4 = vcmp.lt.s32.totalorder %v4545_v43, 5 }
 0x383   : > { %v555_v20 = vrot.slane %v547_v13, %v4494_v17 }
 0x3e3   : > { %v586_v14 = vpop.permute.xlu1 %585 }
 0x3e7   : > { %v588_v22 = vpop.permute.xlu1 %587 }
 0x3e8   : > { %v595_v23 = vcombine.low %v584_v7, %v588_v22  ;;  %v596_v24 = vcombine.high %v584_v7, %v588_v22 }
 0x3ea   : > { %v603_v33 = vrot.slane %v595_v23, %v4483_v8  ;;  %v610_v34 = vrot.slane %v596_v24, %v4483_v8 }
 0x3eb   : > { %v590_v30 = vpop.permute.xlu1 %589 }
 0x3ec   : > { %v611_v31 = vcombine.low %v586_v14, %v590_v30  ;;  %v612_v32 = vcombine.high %v586_v14, %v590_v30  ;;  %v563_v14 = vcombine.low %v538_v2, %v546_v3 }
 0x3ee   : > { %v619_v35 = vrot.slane %v611_v31, %v4483_v8  ;;  %v626_v36 = vrot.slane %v612_v32, %v4483_v8  ;;  %v571_v21 = vrot.slane %v563_v14, %v4494_v17 }
 0x3f0   : > { %v627_v50 = vcombine.low %v603_v33, %v619_v35  ;;  %v628_v51 = vcombine.high %v603_v33, %v619_v35  ;;  %v643_v52 = vcombine.low %v610_v34, %v626_v36  ;;  %v644_v53 = vcombine.high %v610_v34, %v626_v36 }
 0x3f1   : > { %v579_v25 = vcombine.low %v555_v20, %v571_v21  ;;  %v580_v32 = vcombine.high %v555_v20, %v571_v21  ;;  %v562_v33 = vrot.slane %v548_v26, %v4494_v17  ;;  %v578_v34 = vrot.slane %v564_v27, %v4494_v17 }
 0x3f2   : > { %v635_v54 = vrot.slane %v627_v50, %v4494_v17  ;;  %v642_v56 = vrot.slane %v628_v51, %v4494_v17  ;;  %v651_v57 = vrot.slane %v643_v52, %v4494_v17  ;;  %v658_v59 = vrot.slane %v644_v53, %v4494_v17 }
 0x3f3   : > { %v581_v36 = vcombine.low %v562_v33, %v578_v34  ;;  %v582_v42 = vcombine.high %v562_v33, %v578_v34 }
 0x3f4   : > { %v663_v4 = vcombine.low %v635_v54, %v642_v56  ;;  %v3726_v5 = vcombine.high %v635_v54, %v642_v56  ;;  %v679_v6 = vcombine.low %v651_v57, %v658_v59  ;;  %v3727_v7 = vcombine.high %v651_v57, %v658_v59 }
 0x3f6   : > { %v670_v9 = vrot.slane %v663_v4, %v4483_v8  ;;  %v678_v10 = vrot.slane %v3726_v5, %v4483_v8  ;;  %v686_v11 = vrot.slane %v679_v6, %v4483_v8  ;;  %v694_v12 = vrot.slane %v3727_v7, %v4483_v8 }
 0x3f8   : > { %v695_v15 = vcombine.low %v670_v9, %v678_v10  ;;  %v711_v16 = vcombine.low %v686_v11, %v694_v12  ;;  %v696_v22 = vcombine.high %v670_v9, %v678_v10  ;;  %v712_v23 = vcombine.high %v686_v11, %v694_v12 }
 0x3fa   : > { %v703_v18 = vrot.slane %v695_v15, %v4494_v17  ;;  %v719_v19 = vrot.slane %v711_v16, %v4494_v17  ;;  %v710_v30 = vrot.slane %v696_v22, %v4494_v17  ;;  %v726_v31 = vrot.slane %v712_v23, %v4494_v17 }
 0x3fc   : > { %v727_v24 = vcombine.low %v703_v18, %v719_v19  ;;  %v728_v28 = vcombine.high %v703_v18, %v719_v19  ;;  %v729_v35 = vcombine.low %v710_v30, %v726_v31  ;;  %v730_v41 = vcombine.high %v710_v30, %v726_v31 }
 0x3fe   : > { %3876 = vmatpush3.xpose.msk.msra.mxu1 %vm879_vm3, %v727_v24 }
 0x3ff   : > { %3880 = vmatprep.subr.mxu1 %v4192_v1 }
 0x401   : > { %3878 = vmatmul.mubr.msk.f32.vlgmr.msra.gmra.mxu1 %vm879_vm3, %v579_v25 }
 0x402   : > { %3881 = vmatpush3.xpose.msk.msra.mxu1 %vm879_vm3, %v728_v28  ;;  %3882 = vmatprep.mubr.msk.f32.mxu1 %vm4193_vm2, %v4192_v1 }
 0x403   : > { %3885 = vmatprep.subr.mxu1 %v4192_v1 }
 0x405   : > { %3883 = vmatmul.mubr.msk.f32.vlgmr.msra.gmra.mxu1 %vm879_vm3, %v580_v32 }
 0x406   : > { %3886 = vmatpush3.xpose.msk.msra.mxu1 %vm879_vm3, %v729_v35  ;;  %3887 = vmatprep.mubr.msk.f32.mxu1 %vm4193_vm2, %v4192_v1 }
 0x407   : > { %3890 = vmatprep.subr.mxu1 %v4192_v1 }
 0x409   : > { %3888 = vmatmul.mubr.msk.f32.vlgmr.msra.gmra.mxu1 %vm879_vm3, %v581_v36 }
 0x40a   : > { %3891 = vmatpush3.xpose.msk.msra.mxu1 %vm879_vm3, %v730_v41  ;;  %3892 = vmatprep.mubr.msk.f32.mxu1 %vm4193_vm2, %v4192_v1 }
 0x40b   : > { %3895 = vmatprep.subr.mxu1 %v4192_v1 }
 0x40d   : > { %3893 = vmatmul.mubr.msk.f32.vlgmr.msra.gmra.mxu1 %vm879_vm3, %v582_v42 }
 0x40e   : > { %3897 = vmatprep.mubr.msk.f32.mxu1 %vm4193_vm2, %v4192_v1 }
 0x4c1   : > { %v952_v49 = vpop.f32.mrf.mxu1 }
 0x4c2   : > { %v1186_v50 = vsel %vm325_vm4, %v952_v49, -1e+30 }
 0x4c3   : > { %v3879_v51 = vpop.f32.mrf.mxu1  ;;  %v1190_v52 = vsel %vm879_vm3, %v1186_v50, -inf }
 0x4c4   : > { %1191 = vmax.xlane.f32.xlu1 %v1190_v52 }
 0x4c5   : > { %v1028_v53 = vpop.f32.mrf.mxu1 }
 0x4c6   : > { %v1187_v54 = vsel %vm325_vm4, %v1028_v53, -1e+30 }
 0x4c7   : > { %v3884_v56 = vpop.f32.mrf.mxu1  ;;  %v1193_v57 = vsel %vm879_vm3, %v1187_v54, -inf }
 0x4c8   : > { %1194 = vmax.xlane.f32.xlu0 %v1193_v57 }
 0x4c9   : > { %v1104_v44 = vpop.f32.mrf.mxu1 }
 0x4ca   : > { %v1188_v59 = vsel %vm325_vm4, %v1104_v44, -1e+30 }
 0x4cb   : > { %v3889_v63 = vpop.f32.mrf.mxu1  ;;  %v1196_v0 = vsel %vm879_vm3, %v1188_v59, -inf }
 0x4cc   : > { %1197 = vmax.xlane.f32.xlu1 %v1196_v0 }
 0x4cd   : > { %v1180_v2 = vpop.f32.mrf.mxu1 }
 0x4ce   : > { %v1189_v3 = vsel %vm325_vm4, %v1180_v2, -1e+30 }
 0x4cf   : > { %v3894_v4 = vpop.f32.mrf.mxu1  ;;  %v1199_v5 = vsel %vm879_vm3, %v1189_v3, -inf }
 0x4d0   : > { %1200 = vmax.xlane.f32.xlu0 %v1199_v5 }
 0x4dd   : > { %733 = vrot.lane.b32.xlu1 %v4466_v60, %s4200_s12 }
 0x4e6   : > { %731 = vrot.lane.b32.xlu0 %v4456_v58, %s4200_s12 }
 0x54d   : > { %v1192_v6 = vpop.xlane.xlu1 %1191 }
 0x54e   : > { %v1202_v7 = vsub.f32 %v1186_v50, %v1192_v6 }
 0x550   : > { %v1206_v9 = vmul.f32 1.442695, %v1202_v7 }
 0x551   : > { %v1195_v10 = vpop.xlane.xlu0 %1194 }
 0x552   : > { %4086 = vpow2.f32 %v1206_v9  ;;  %v1203_v11 = vsub.f32 %v1187_v54, %v1195_v10 }
 0x554   : > { %v1208_v12 = vmul.f32 1.442695, %v1203_v11 }
 0x555   : > { %v1198_v58 = vpop.xlane.xlu1 %1197 }
 0x556   : > { %4088 = vpow2.f32 %v1208_v12  ;;  %v1204_v16 = vsub.f32 %v1188_v59, %v1198_v58 }
 0x558   : > { %v1210_v19 = vmul.f32 1.442695, %v1204_v16 }
 0x559   : > { %v1201_v18 = vpop.xlane.xlu0 %1200 }
 0x55a   : > { %v1205_v20 = vsub.f32 %v1189_v3, %v1201_v18  ;;  %4090 = vpow2.f32 %v1210_v19 }
 0x55c   : > { %v1212_v21 = vmul.f32 1.442695, %v1205_v20 }
 0x55d   : > { %v732_v25 = vpop.permute.xlu0 %731 }
 0x55e   : > { %4092 = vpow2.f32 %v1212_v21 }
 0x55f   : > { %v4087_v13 = vpop.eup %4086 }
 0x560   : > { %v1214_v14 = vsel %vm879_vm3, %v4087_v13, 0.0 }
 0x561   : > { %1215 = vadd.xlane.f32.xlu1 %v1214_v14 }
 0x563   : > { %v4565_v15 = vpop.eup %4088 }
 0x564   : > { %v1217_v60 = vsel %vm879_vm3, %v4565_v15, 0.0 }
 0x565   : > { %1218 = vadd.xlane.f32.xlu0 %v1217_v60 }
 0x567   : > { %v4573_v22 = vpop.eup %4090 }
 0x568   : > { %v1220_v23 = vsel %vm879_vm3, %v4573_v22, 0.0 }
 0x56b   : > { %v4577_v24 = vpop.eup %4092 }
 0x572   : > { %735 = vrot.lane.b32.xlu1 %v4470_v61, %s4200_s12  ;;  %v1223_v61 = vsel %vm879_vm3, %v4577_v24, 0.0 }
 0x57b   : > { %737 = vrot.lane.b32.xlu0 %v4474_v62, %s4200_s12  ;;  %v734_v62 = vpop.permute.xlu1 %733 }
 0x57f   : > { %1693 = vrot.lane.b32.xlu0 %v4404_v37, %s4201_s13 }
 0x583   : > { %1691 = vrot.lane.b32.xlu0 %v4409_v38, %s4201_s13 }
 0x587   : > { %1689 = vrot.lane.b32.xlu0 %v4418_v39, %s4201_s13 }
 0x596   : > { %1221 = vadd.xlane.f32.xlu1 %v1220_v23 }
 0x59a   : > { %1224 = vadd.xlane.f32.xlu1 %v1223_v61 }
 0x5ea   : > { %v1216_v26 = vpop.xlane.xlu1 %1215 }
 0x5eb   : > { %4094 = vrcp.f32 %v1216_v26 }
 0x5ee   : > { %v736_v27 = vpop.permute.xlu1 %735  ;;  %v1219_v28 = vpop.xlane.xlu0 %1218 }
 0x5ef   : > { %v743_v30 = vcombine.low %v732_v25, %v736_v27  ;;  %v744_v31 = vcombine.high %v732_v25, %v736_v27  ;;  %4096 = vrcp.f32 %v1219_v28 }
 0x5f1   : > { %v751_v35 = vrot.slane %v743_v30, %v4483_v8  ;;  %v758_v36 = vrot.slane %v744_v31, %v4483_v8 }
 0x5f2   : > { %v738_v32 = vpop.permute.xlu0 %737 }
 0x5f3   : > { %v759_v33 = vcombine.low %v734_v62, %v738_v32  ;;  %v760_v34 = vcombine.high %v734_v62, %v738_v32 }
 0x5f5   : > { %v767_v41 = vrot.slane %v759_v33, %v4483_v8  ;;  %v774_v42 = vrot.slane %v760_v34, %v4483_v8 }
 0x5f6   : > { %v1694_v31 = vpop.permute.xlu0 %1693 }
 0x5f7   : > { %v775_v49 = vcombine.low %v751_v35, %v767_v41  ;;  %v776_v50 = vcombine.high %v751_v35, %v767_v41  ;;  %v791_v51 = vcombine.low %v758_v36, %v774_v42  ;;  %v792_v52 = vcombine.high %v758_v36, %v774_v42 }
 0x5f8   : > { %v4095_v9 = vpop.eup %4094 }
 0x5f9   : > { %v783_v53 = vrot.slane %v775_v49, %v4494_v17  ;;  %v790_v54 = vrot.slane %v776_v50, %v4494_v17  ;;  %v799_v56 = vrot.slane %v791_v51, %v4494_v17  ;;  %v806_v57 = vrot.slane %v792_v52, %v4494_v17 }
 0x5fa   : > { %v1227_v58 = vmul.f32 %v4095_v9, %v4087_v13  ;;  %v1692_v34 = vpop.permute.xlu0 %1691 }
 0x5fb   : > { %v811_v44 = vcombine.low %v783_v53, %v790_v54  ;;  %v3728_v59 = vcombine.high %v783_v53, %v790_v54  ;;  %v827_v63 = vcombine.low %v799_v56, %v806_v57  ;;  %v3729_v0 = vcombine.high %v799_v56, %v806_v57 }
 0x5fc   : > { %v4097_v16 = vpop.eup %4096 }
 0x5fd   : > { %v818_v2 = vrot.slane %v811_v44, %v4483_v8  ;;  %v826_v3 = vrot.slane %v3728_v59, %v4483_v8  ;;  %v834_v4 = vrot.slane %v827_v63, %v4483_v8  ;;  %v842_v5 = vrot.slane %v3729_v0, %v4483_v8 }
 0x5fe   : > { %v1229_v21 = vmul.f32 %v4097_v16, %v4565_v15  ;;  %v1690_v42 = vpop.permute.xlu0 %1689 }
 0x5ff   : > { %v843_v6 = vcombine.low %v818_v2, %v826_v3  ;;  %v859_v7 = vcombine.low %v834_v4, %v842_v5  ;;  %v844_v12 = vcombine.high %v818_v2, %v826_v3  ;;  %v860_v14 = vcombine.high %v834_v4, %v842_v5 }
 0x601   : > { %v851_v10 = vrot.slane %v843_v6, %v4494_v17  ;;  %v867_v11 = vrot.slane %v859_v7, %v4494_v17  ;;  %v858_v19 = vrot.slane %v844_v12, %v4494_v17  ;;  %v874_v20 = vrot.slane %v860_v14, %v4494_v17 }
 0x603   : > { %v875_v60 = vcombine.low %v851_v10, %v867_v11  ;;  %v876_v18 = vcombine.high %v851_v10, %v867_v11  ;;  %v877_v13 = vcombine.low %v858_v19, %v874_v20  ;;  %v878_v26 = vcombine.high %v858_v19, %v874_v20 }
 0x605   : > { %3896 = vmatpush3.msra.mxu1 %v875_v60 }
 0x606   : > { %3898 = vmatmul.mubr.msk.f32.vlgmr.msra.gmra.mxu1 %vm879_vm3, %v1227_v58  ;;  %3900 = vmatprep.subr.mxu1 %v4192_v1 }
 0x607   : > { %3901 = vmatpush3.msra.mxu1 %v876_v18  ;;  %3902 = vmatprep.mubr.msk.f32.mxu1 %vm4193_vm2, %v4192_v1 }
 0x608   : > { %3905 = vmatprep.subr.mxu1 %v4192_v1 }
 0x60a   : > { %3903 = vmatmul.mubr.msk.f32.vlgmr.msra.gmra.mxu1 %vm879_vm3, %v1229_v21 }
 0x60b   : > { %3906 = vmatpush3.msra.mxu1 %v877_v13  ;;  %3907 = vmatprep.mubr.msk.f32.mxu1 %vm4193_vm2, %v4192_v1 }
 0x60c   : > { %3910 = vmatprep.subr.mxu1 %v4192_v1 }
 0x61f   : > { %v1222_v23 = vpop.xlane.xlu1 %1221 }
 0x620   : > { %4098 = vrcp.f32 %v1222_v23 }
 0x623   : > { %v1225_v61 = vpop.xlane.xlu1 %1224 }
 0x624   : > { %4100 = vrcp.f32 %v1225_v61 }
 0x62d   : > { %v4099_v62 = vpop.eup %4098 }
 0x62e   : > { %v1231_v25 = vmul.f32 %v4099_v62, %v4573_v22 }
 0x630   : > { %3908 = vmatmul.mubr.msk.f32.vlgmr.msra.gmra.mxu1 %vm879_vm3, %v1231_v25 }
 0x631   : > { %v4101_v15 = vpop.eup %4100  ;;  %3911 = vmatpush3.msra.mxu1 %v878_v26  ;;  %3912 = vmatprep.mubr.msk.f32.mxu1 %vm4193_vm2, %v4192_v1 }
 0x632   : > { %v1233_v27 = vmul.f32 %v4101_v15, %v4577_v24  ;;  %3915 = vmatprep.subr.mxu1 %v4192_v1 }
 0x634   : > { %3913 = vmatmul.mubr.msk.f32.vlgmr.msra.gmra.mxu1 %vm879_vm3, %v1233_v27 }
 0x635   : > { %3923 = vmatprep.mubr.msk.f32.mxu1 %vm4193_vm2, %v4192_v1  ;;  %3916 = vmatpush3.msra.mxu1 %v1694_v31 }
 0x636   : > { %3917 = vmatprep.subr.mxu1 %v4192_v1 }
 0x637   : > { %3918 = vmatpush3.msra.mxu1 %v1692_v34 }
 0x638   : > { %3919 = vmatprep.subr.mxu1 %v4192_v1 }
 0x639   : > { %3920 = vmatpush3.msra.mxu1 %v1690_v42  ;;  %v327_v42 = vld [vmem:[%s5054_s3 + $0x8] sm:$0xff] }
 0x63a   : > { %3921 = vmatprep.subr.mxu1 %v4192_v1 }
 0x6c6   : > { %v1303_v22 = vpop.f32.mrf.mxu1 }
 0x6c8   : > { %v3899_v28 = vpop.f32.mrf.mxu1 }
 0x6ca   : > { %v1376_v24 = vpop.f32.mrf.mxu1 }
 0x6cc   : > { %v3904_v30 = vpop.f32.mrf.mxu1 }
 0x6f0   : > { %v1449_v32 = vpop.f32.mrf.mxu1 }
 0x6f1   : > { %v1526_v35 = vcombine.low %v1303_v22, %v1449_v32  ;;  %v1527_v36 = vcombine.high %v1303_v22, %v1449_v32 }
 0x6f2   : > { %v3909_v33 = vpop.f32.mrf.mxu1 }
 0x6f3   : > { %v1534_v49 = vrot.slane %v1526_v35, %v4483_v8  ;;  %v1541_v50 = vrot.slane %v1527_v36, %v4483_v8 }
 0x6f4   : > { %v1522_v37 = vpop.f32.mrf.mxu1 }
 0x6f5   : > { %v1542_v38 = vcombine.low %v1376_v24, %v1522_v37  ;;  %v1543_v41 = vcombine.high %v1376_v24, %v1522_v37 }
 0x6f6   : > { %v3914_v39 = vpop.f32.mrf.mxu1 }
 0x6f7   : > { %v1550_v51 = vrot.slane %v1542_v38, %v4483_v8  ;;  %v1557_v52 = vrot.slane %v1543_v41, %v4483_v8  ;;  %v333_v41 = vld [vmem:[%s5054_s3 + $0x38] sm:$0xff] }
 0x6f8   : > { %v329_v39 = vld [vmem:[%s5054_s3 + $0x18] sm:$0xff] }
 0x6f9   : > { %v1558_v53 = vcombine.low %v1534_v49, %v1550_v51  ;;  %v1559_v54 = vcombine.high %v1534_v49, %v1550_v51  ;;  %v1574_v56 = vcombine.low %v1541_v50, %v1557_v52  ;;  %v1575_v57 = vcombine.high %v1541_v50, %v1557_v52 }
 0x6fa   : > { %v1788_v52 = vsub.s32 4, %v4434_v45 }
 0x6fb   : > { %v1566_v44 = vrot.slane %v1558_v53, %v4494_v17  ;;  %v1573_v59 = vrot.slane %v1559_v54, %v4494_v17  ;;  %v1582_v63 = vrot.slane %v1574_v56, %v4494_v17  ;;  %v1589_v0 = vrot.slane %v1575_v57, %v4494_v17 }
 0x6fc   : > { %v1793_v53 = vsub.s32 5, %v4434_v45  ;;  %v1789_v54 = vrot.slane %v4440_v47, %v1788_v52 }
 0x6fd   : > { %v1594_v2 = vcombine.low %v1566_v44, %v1573_v59  ;;  %v3742_v3 = vcombine.high %v1566_v44, %v1573_v59  ;;  %v1610_v4 = vcombine.low %v1582_v63, %v1589_v0  ;;  %v3743_v5 = vcombine.high %v1582_v63, %v1589_v0 }
 0x6fe   : > { %v1794_v44 = vrot.slane %v4440_v47, %v1793_v53 }
 0x6ff   : > { %v1601_v6 = vrot.slane %v1594_v2, %v4483_v8  ;;  %v1609_v7 = vrot.slane %v3742_v3, %v4483_v8  ;;  %v1617_v9 = vrot.slane %v1610_v4, %v4483_v8  ;;  %v1625_v10 = vrot.slane %v3743_v5, %v4483_v8 }
 0x700   : > { %v1798_v5 = vsub.s32 6, %v4434_v45 }
 0x701   : > { %v1626_v11 = vcombine.low %v1601_v6, %v1609_v7  ;;  %v1642_v12 = vcombine.low %v1617_v9, %v1625_v10  ;;  %v1627_v14 = vcombine.high %v1601_v6, %v1609_v7  ;;  %v1643_v60 = vcombine.high %v1617_v9, %v1625_v10 }
 0x702   : > { %v1799_v6 = vrot.slane %v4440_v47, %v1798_v5 }
 0x703   : > { %v1634_v58 = vrot.slane %v1626_v11, %v4494_v17  ;;  %v1650_v16 = vrot.slane %v1642_v12, %v4494_v17  ;;  %v1641_v19 = vrot.slane %v1627_v14, %v4494_v17  ;;  %v1657_v20 = vrot.slane %v1643_v60, %v4494_v17 }
 0x705   : > { %v1659_v18 = vcombine.high %v1634_v58, %v1650_v16  ;;  %v1658_v21 = vcombine.low %v1634_v58, %v1650_v16  ;;  %v1660_v13 = vcombine.low %v1641_v19, %v1657_v20  ;;  %v1661_v23 = vcombine.high %v1641_v19, %v1657_v20 }
 0x707   : > { %1663 = vrot.lane.b32.xlu0 %v1659_v18, %s4202_s17 }
 0x70b   : > { %1667 = vrot.lane.b32.xlu0 %v1660_v13, %s4203_s14 }
 0x70f   : > { %1671 = vrot.lane.b32.xlu0 %v1661_v23, %s4204_s15 }
 0x713   : > { %1687 = vrot.lane.b32.xlu0 %v4427_v40, %s4201_s13  ;;  %v1681_v40 = vsub.s32 3, %v4434_v45 }
 0x715   : > { %v1682_v28 = vrot.slane %v4440_v47, %v1681_v40 }
 0x779   : > { %v1664_v61 = vpop.permute.xlu0 %1663 }
 0x77a   : > { %v1674_v26 = vsel %vm879_vm3, %v1658_v21, %v1664_v61  ;;  %v1884_v21 = vsub.s32 7, %v4434_v45 }
 0x77c   : > { %v1885_v13 = vrot.slane %v4440_v47, %v1884_v21  ;;  %v4724_v47 = vld [vmem:[%s5054_s3 + $0x70] sm:$0xff] }
 0x77d   : > { %v1668_v62 = vpop.permute.xlu0 %1667  ;;  %3949 = vmatpush3.msra.mxu0 %v4724_v47 }
 0x77e   : > { %v1676_v15 = vsel %vm1675_vm5, %v1674_v26, %v1668_v62  ;;  %3950 = vmatprep.subr.mxu0 %v4192_v1 }
 0x781   : > { %v1672_v25 = vpop.permute.xlu0 %1671 }
 0x782   : > { %v1678_v22 = vsel %vm1677_vm6, %v1676_v15, %v1672_v25 }
 0x785   : > { %v1688_v27 = vpop.permute.xlu0 %1687 }
 0x786   : > { %3922 = vmatpush3.msra.mxu1 %v1688_v27 }
 0x787   : > { %3924 = vmatmul.mubr.msk.f32.vlgmr.msra.gmra.mxu1 %vm335_vm1, %v1678_v22  ;;  %3926 = vmatprep.subr.mxu1 %v4192_v1 }
 0x788   : > { %3934 = vmatprep.mubr.msk.f32.mxu1 %vm4193_vm2, %v4192_v1  ;;  %3927 = vmatpush3.msra.mxu1 %v333_v41 }
 0x789   : > { %3928 = vmatprep.subr.mxu1 %v4192_v1 }
 0x847   : > { %v1768_v24 = vpop.f32.mrf.mxu1 }
 0x848   : > { %v1769_v30 = vadd.f32 %v1768_v24, %v1682_v28 }
 0x849   : > { %v3925_v31 = vpop.f32.mrf.mxu1 }
 0x84a   : > { %v4658_v32 = vadd.f32 %v1769_v30, %v4395_v29  ;;  %v331_v29 = vld [vmem:[%s5054_s3 + $0x28] sm:$0xff]  ;;  %v4730_v30 = vld [vmem:[%s5054_s3 + $0x60] sm:$0xff]  ;;  %v4736_v31 = vld [vmem:[%s5054_s3 + $0x50] sm:$0xff] }
 0x84b   : > { %3929 = vmatpush3.msra.mxu1 %v331_v29  ;;  %3951 = vmatpush3.msra.mxu0 %v4730_v30 }
 0x84c   : > { %v1773_v33 = vsel %vm335_vm1, %v4658_v32, 0.0  ;;  %3930 = vmatprep.subr.mxu1 %v4192_v1  ;;  %3952 = vmatprep.subr.mxu0 %v4192_v1 }
 0x84d   : > { %1774 = vadd.xlane.f32.xlu0 %v1773_v33  ;;  %3931 = vmatpush3.msra.mxu1 %v329_v39 }
 0x84e   : > { %3932 = vmatprep.subr.mxu1 %v4192_v1  ;;  %3953 = vmatpush3.msra.mxu0 %v4736_v31 }
 0x84f   : > { %3933 = vmatpush3.msra.mxu1 %v327_v42  ;;  %3954 = vmatprep.subr.mxu0 %v4192_v1 }
 0x850   : > { %3937 = vmatprep.subr.mxu1 %v4192_v1 }
 0x863   : > { %1892 = vrot.lane.b32.xlu0 %v329_v39, %s4200_s12 }
 0x8d6   : > { %v1775_v34 = vpop.xlane.xlu0 %1774 }
 0x8d7   : > { %v1776_v35 = vmul.f32 0.03125, %v1775_v34 }
 0x8d9   : > { %v1777_v36 = vsub.f32 %v4658_v32, %v1776_v35 }
 0x8da   : > { %v1893_v3 = vpop.permute.xlu0 %1892 }
 0x8db   : > { %v1778_v37 = vmul.f32 %v1777_v36, %v1777_v36 }
 0x8dd   : > { %v1779_v38 = vsel %vm335_vm1, %v1778_v37, 0.0 }
 0x8de   : > { %1780 = vadd.xlane.f32.xlu1 %v1779_v38 }
 0x8ef   : > { %1896 = vrot.lane.b32.xlu1 %v333_v41, %s4200_s12 }
 0x8f3   : > { %1894 = vrot.lane.b32.xlu1 %v331_v29, %s4200_s12 }
 0x8f7   : > { %1890 = vrot.lane.b32.xlu1 %v327_v42, %s4200_s12 }
 0x967   : > { %v1781_v49 = vpop.xlane.xlu1 %1780 }
 0x968   : > { %v1782_v50 = vmul.f32 0.03125, %v1781_v49 }
 0x96a   : > { %v1783_v51 = vadd.f32 1e-12, %v1782_v50 }
 0x96b   : > { %v1897_v0 = vpop.permute.xlu1 %1896 }
 0x96c   : > { %4102 = vrsqrt.f32 %v1783_v51 }
 0x96f   : > { %v1895_v2 = vpop.permute.xlu1 %1894 }
 0x973   : > { %v1891_v4 = vpop.permute.xlu1 %1890 }
 0x979   : > { %v4103_v56 = vpop.eup %4102 }
 0x97a   : > { %v1785_v57 = vmul.f32 %v4103_v56, %v1777_v36  ;;  %v4752_v36 = vld [vmem:[%s5055_s4 + $0x8] sm:$0xff] }
 0x97b   : > { %v2007_v37 = vrot.slane %v4752_v36, %v352_v46  ;;  %v2012_v41 = vrot.slane %v4752_v36, %v357_v48  ;;  %v2017_v49 = vrot.slane %v4752_v36, %v362_v55 }
 0x97c   : > { %v1790_v59 = vmul.f32 %v1789_v54, %v1785_v57 }
 0x97e   : > { %v1795_v63 = vadd.f32 %v1794_v44, %v1790_v59 }
 0x980   : > { %3935 = vmatmul.mubr.msk.f32.vlgmr.msra.gmra.mxu1 %vm335_vm1, %v1795_v63 }
 0x981   : > { %3945 = vmatprep.mubr.msk.f32.mxu1 %vm4193_vm2, %v4192_v1  ;;  %3938 = vmatpush3.xpose.msk.msra.mxu1 %vm249_vm0, %v1897_v0 }
 0x982   : > { %3939 = vmatprep.subr.mxu1 %v4192_v1 }
 0x985   : > { %3940 = vmatpush3.xpose.msk.msra.mxu1 %vm249_vm0, %v1895_v2 }
 0x986   : > { %3941 = vmatprep.subr.mxu1 %v4192_v1 }
 0x989   : > { %3942 = vmatpush3.xpose.msk.msra.mxu1 %vm249_vm0, %v1893_v3 }
 0x98a   : > { %3943 = vmatprep.subr.mxu1 %v4192_v1 }
 0x98d   : > { %3944 = vmatpush3.xpose.msk.msra.mxu1 %vm249_vm0, %v1891_v4 }
 0x98e   : > { %3964 = vmatprep.subr.mxu1 %v4192_v1 }
 0xa40   : > { %v1869_v7 = vpop.f32.mrf.mxu1 }
 0xa41   : > { %v1870_v9 = vadd.f32 %v1869_v7, %v1799_v6 }
 0xa42   : > { %v3936_v10 = vpop.f32.mrf.mxu1 }
 0xa43   : > { %v1873_v11 = vmul.f32 %v1870_v9, %v1870_v9 }
 0xa45   : > { %v1874_v12 = vmul.f32 %v1873_v11, %v1870_v9 }
 0xa47   : > { %v1875_v14 = vmul.f32 0.044715, %v1874_v12 }
 0xa49   : > { %v1876_v60 = vadd.f32 %v1875_v14, %v1870_v9 }
 0xa4b   : > { %v1877_v58 = vmul.f32 0.7978846, %v1876_v60 }
 0xa4d   : > { %4104 = vtanh.f32 %v1877_v58 }
 0xa5a   : > { %v4105_v16 = vpop.eup %4104 }
 0xa5b   : > { %v1879_v18 = vadd.f32 1.0, %v4105_v16 }
 0xa5d   : > { %v1880_v19 = vmul.f32 0.5, %v1879_v18 }
 0xa5f   : > { %v1881_v20 = vmul.f32 %v1880_v19, %v1870_v9 }
 0xa61   : > { %3946 = vmatmul.mubr.msk.f32.vlgmr.msra.gmra.mxu1 %vm249_vm0, %v1881_v20 }
 0xa62   : > { %3966 = vmatprep.mubr.msk.f32.mxu1 %vm4193_vm2, %v4192_v1 }
 0xb21   : > { %v1975_v23 = vpop.f32.mrf.mxu1 }
 0xb22   : > { %v1976_v61 = vadd.f32 %v1975_v23, %v1885_v13 }
 0xb23   : > { %v3947_v62 = vpop.f32.mrf.mxu1 }
 0xb24   : > { %v4715_v25 = vadd.f32 %v1976_v61, %v4658_v32  ;;  %v4743_v32 = vld [vmem:[%s5054_s3 + $0x40] sm:$0xff] }
 0xb25   : > { %3955 = vmatpush3.msra.mxu0 %v4743_v32 }
 0xb26   : > { %v1991_v26 = vsel %vm335_vm1, %v4715_v25, 0.0  ;;  %3959 = vmatprep.subr.mxu0 %v4192_v1 }
 0xb27   : > { %1992 = vadd.xlane.f32.xlu1 %v1991_v26 }
 0xbb0   : > { %v1993_v15 = vpop.xlane.xlu1 %1992 }
 0xbb1   : > { %v1994_v27 = vmul.f32 0.03125, %v1993_v15 }
 0xbb3   : > { %v1995_v22 = vsub.f32 %v4715_v25, %v1994_v27 }
 0xbb5   : > { %v1996_v28 = vmul.f32 %v1995_v22, %v1995_v22 }
 0xbb7   : > { %v1997_v24 = vsel %vm335_vm1, %v1996_v28, 0.0 }
 0xbb8   : > { %1998 = vadd.xlane.f32.xlu0 %v1997_v24 }
 0xc41   : > { %v1999_v33 = vpop.xlane.xlu0 %1998 }
 0xc42   : > { %v2000_v34 = vmul.f32 0.03125, %v1999_v33 }
 0xc44   : > { %v2001_v35 = vadd.f32 1e-12, %v2000_v34 }
 0xc46   : > { %4106 = vrsqrt.f32 %v2001_v35 }
 0xc53   : > { %v4107_v38 = vpop.eup %4106 }
 0xc54   : > { %v2003_v29 = vmul.f32 %v4107_v38, %v1995_v22 }
 0xc56   : > { %v2008_v39 = vmul.f32 %v2007_v37, %v2003_v29 }
 0xc58   : > { %v2013_v42 = vadd.f32 %v2012_v41, %v2008_v39 }
 0xc5a   : > { %3957 = vmatmul.mubr.msk.f32.vlgmr.msra.gmra.mxu0 %vm335_vm1, %v2013_v42 }
 0xc5b   : > { %3961 = vmatprep.mubr.msk.f32.mxu0 %vm4193_vm2, %v4192_v1 }
 0xd1a   : > { %v2087_v50 = vpop.f32.mrf.mxu0 }
 0xd1b   : > { %v4766_v51 = vadd.f32 %v2087_v50, %v2017_v49 }
 0xd1c   : > { %v3958_v46 = vpop.f32.mrf.mxu0 }
 0xd1d   : > { %2095 = vrot.lane.b32.xlu0 %v4766_v51, %s4196_s10  ;;  %2092 = vrot.lane.b32.xlu1 %v4766_v51, %s4195_s9  ;;  %s3659_s10 = scalar_lea.hbm %s5056_s5, %s3788_s23 }
 0xd21   : > { %2098 = vrot.lane.b32.xlu1 %v4766_v51, %s4194_s8 }
 0xd25   : > { %2237 = vrot.lane.b32.xlu1 %v4766_v51, %s4197_s11 }
 0xd8f   : > { %v4776_v48 = vpop.permute.xlu1 %2092  ;;  %v4780_v55 = vpop.permute.xlu0 %2095 }
 0xd90   : > { %2239 = vrot.lane.b32.xlu1 %v4776_v48, %s4197_s11  ;;  %v2101_v59 = vcombine.low %v4766_v51, %v4780_v55  ;;  %v2102_v63 = vcombine.high %v4766_v51, %v4780_v55 }
 0xd92   : > { %v2109_v4 = vrot.slane %v2101_v59, %v4483_v8  ;;  %v2116_v6 = vrot.slane %v2102_v63, %v4483_v8 }
 0xd93   : > { %v4784_v54 = vpop.permute.xlu1 %2098 }
 0xd94   : > { %2241 = vrot.lane.b32.xlu1 %v4780_v55, %s4197_s11  ;;  %v2117_v56 = vcombine.low %v4776_v48, %v4784_v54  ;;  %v2118_v57 = vcombine.high %v4776_v48, %v4784_v54 }
 0xd96   : > { %v2125_v0 = vrot.slane %v2117_v56, %v4483_v8  ;;  %v2132_v2 = vrot.slane %v2118_v57, %v4483_v8 }
 0xd97   : > { %v2238_v44 = vpop.permute.xlu1 %2237 }
 0xd98   : > { %2243 = vrot.lane.b32.xlu1 %v4784_v54, %s4197_s11  ;;  %v2133_v7 = vcombine.low %v2109_v4, %v2125_v0  ;;  %v2134_v9 = vcombine.high %v2109_v4, %v2125_v0  ;;  %v2149_v10 = vcombine.low %v2116_v6, %v2132_v2  ;;  %v2150_v11 = vcombine.high %v2116_v6, %v2132_v2 }
 0xd9a   : > { %v2141_v58 = vrot.slane %v2133_v7, %v4494_v17  ;;  %v2148_v16 = vrot.slane %v2134_v9, %v4494_v17  ;;  %v2157_v18 = vrot.slane %v2149_v10, %v4494_v17  ;;  %v2164_v19 = vrot.slane %v2150_v11, %v4494_v17 }
 0xd9c   : > { %v2169_v27 = vcombine.low %v2141_v58, %v2148_v16  ;;  %v3761_v22 = vcombine.high %v2141_v58, %v2148_v16  ;;  %v2185_v28 = vcombine.low %v2157_v18, %v2164_v19  ;;  %v3762_v24 = vcombine.high %v2157_v18, %v2164_v19 }
 0xd9e   : > { %v2176_v42 = vrot.slane %v2169_v27, %v4483_v8  ;;  %v2184_v49 = vrot.slane %v3761_v22, %v4483_v8  ;;  %v2192_v50 = vrot.slane %v2185_v28, %v4483_v8  ;;  %v2200_v46 = vrot.slane %v3762_v24, %v4483_v8 }
 0xda0   : > { %v2201_v4 = vcombine.low %v2176_v42, %v2184_v49  ;;  %v2217_v6 = vcombine.low %v2192_v50, %v2200_v46  ;;  %v2218_v18 = vcombine.high %v2192_v50, %v2200_v46 }
 0xda2   : > { %v2209_v58 = vrot.slane %v2201_v4, %v4494_v17  ;;  %v2225_v16 = vrot.slane %v2217_v6, %v4494_v17 }
 0xe02   : > { %v2240_v3 = vpop.permute.xlu1 %2239 }
 0xe06   : > { %v2242_v12 = vpop.permute.xlu1 %2241 }
 0xe07   : > { %v2249_v14 = vcombine.low %v2238_v44, %v2242_v12  ;;  %v2250_v60 = vcombine.high %v2238_v44, %v2242_v12 }
 0xe09   : > { %v2257_v61 = vrot.slane %v2249_v14, %v4483_v8  ;;  %v2264_v62 = vrot.slane %v2250_v60, %v4483_v8  ;;  %v2202_v60 = vcombine.high %v2176_v42, %v2184_v49 }
 0xe0a   : > { %v2244_v20 = vpop.permute.xlu1 %2243 }
 0xe0b   : > { %v2265_v13 = vcombine.low %v2240_v3, %v2244_v20  ;;  %v2266_v23 = vcombine.high %v2240_v3, %v2244_v20 }
 0xe0d   : > { %v2273_v26 = vrot.slane %v2265_v13, %v4483_v8  ;;  %v2280_v15 = vrot.slane %v2266_v23, %v4483_v8 }
 0xe0f   : > { %v2281_v33 = vcombine.low %v2257_v61, %v2273_v26  ;;  %v2282_v34 = vcombine.high %v2257_v61, %v2273_v26  ;;  %v2297_v35 = vcombine.low %v2264_v62, %v2280_v15  ;;  %v2298_v37 = vcombine.high %v2264_v62, %v2280_v15 }
 0xe10   : > { %v2216_v61 = vrot.slane %v2202_v60, %v4494_v17  ;;  %v2233_v62 = vcombine.low %v2209_v58, %v2225_v16  ;;  %v2234_v26 = vcombine.high %v2209_v58, %v2225_v16  ;;  %v2232_v15 = vrot.slane %v2218_v18, %v4494_v17 }
 0xe11   : > { %v2289_v38 = vrot.slane %v2281_v33, %v4494_v17  ;;  %v2296_v41 = vrot.slane %v2282_v34, %v4494_v17  ;;  %v2305_v29 = vrot.slane %v2297_v35, %v4494_v17  ;;  %v2312_v39 = vrot.slane %v2298_v37, %v4494_v17 }
 0xe12   : > { %v2235_v28 = vcombine.low %v2216_v61, %v2232_v15  ;;  %v2236_v24 = vcombine.high %v2216_v61, %v2232_v15 }
 0xe13   : > { %v2317_v56 = vcombine.low %v2289_v38, %v2296_v41  ;;  %v3763_v57 = vcombine.high %v2289_v38, %v2296_v41  ;;  %v2333_v44 = vcombine.low %v2305_v29, %v2312_v39  ;;  %v3764_v59 = vcombine.high %v2305_v29, %v2312_v39 }
 0xe15   : > { %v2324_v63 = vrot.slane %v2317_v56, %v4483_v8  ;;  %v2332_v0 = vrot.slane %v3763_v57, %v4483_v8  ;;  %v2340_v2 = vrot.slane %v2333_v44, %v4483_v8  ;;  %v2348_v3 = vrot.slane %v3764_v59, %v4483_v8 }
 0xe17   : > { %v2349_v7 = vcombine.low %v2324_v63, %v2332_v0  ;;  %v2350_v9 = vcombine.high %v2324_v63, %v2332_v0  ;;  %v2365_v10 = vcombine.low %v2340_v2, %v2348_v3  ;;  %v2366_v11 = vcombine.high %v2340_v2, %v2348_v3 }
 0xe19   : > { %v2357_v12 = vrot.slane %v2349_v7, %v4494_v17  ;;  %v2373_v14 = vrot.slane %v2365_v10, %v4494_v17  ;;  %v2364_v13 = vrot.slane %v2350_v9, %v4494_v17  ;;  %v2380_v23 = vrot.slane %v2366_v11, %v4494_v17 }
 0xe1b   : > { %v2381_v19 = vcombine.low %v2357_v12, %v2373_v14  ;;  %v2382_v20 = vcombine.high %v2357_v12, %v2373_v14  ;;  %v2383_v27 = vcombine.low %v2364_v13, %v2380_v23  ;;  %v2384_v22 = vcombine.high %v2364_v13, %v2380_v23 }
 0xe1d   : > { %3960 = vmatpush3.xpose.msk.msra.mxu0 %vm879_vm3, %v2381_v19  ;;  %3965 = vmatpush3.xpose.msk.msra.mxu1 %vm879_vm3, %v2382_v20 }
 0xe1e   : > { %3969 = vmatprep.subr.mxu0 %v4192_v1  ;;  %3974 = vmatprep.subr.mxu1 %v4192_v1 }
 0xe20   : > { %3962 = vmatmul.mubr.msk.f32.vlgmr.msra.gmra.mxu0 %vm879_vm3, %v2233_v62  ;;  %3967 = vmatmul.mubr.msk.f32.vlgmr.msra.gmra.mxu1 %vm879_vm3, %v2234_v26 }
 0xe21   : > { %3970 = vmatpush3.xpose.msk.msra.mxu0 %vm879_vm3, %v2383_v27  ;;  %3975 = vmatpush3.xpose.msk.msra.mxu1 %vm879_vm3, %v2384_v22 }
 0xe22   : > { %3971 = vmatprep.mubr.msk.f32.mxu0 %vm4193_vm2, %v4192_v1  ;;  %3976 = vmatprep.mubr.msk.f32.mxu1 %vm4193_vm2, %v4192_v1 }
 0xe23   : > { %3979 = vmatprep.subr.mxu0 %v4192_v1  ;;  %3984 = vmatprep.subr.mxu1 %v4192_v1 }
 0xe24   : > { %3972 = vmatmul.mubr.msk.f32.vlgmr.msra.gmra.mxu0 %vm879_vm3, %v2235_v28  ;;  %3977 = vmatmul.mubr.msk.f32.vlgmr.msra.gmra.mxu1 %vm879_vm3, %v2236_v24 }
 0xe25   : > { %3981 = vmatprep.mubr.msk.f32.mxu0 %vm4193_vm2, %v4192_v1  ;;  %3986 = vmatprep.mubr.msk.f32.mxu1 %vm4193_vm2, %v4192_v1 }
 0xee0   : > { %v2605_v33 = vpop.f32.mrf.mxu0  ;;  %v2681_v34 = vpop.f32.mrf.mxu1 }
 0xee1   : > { %v2837_v35 = vsel %vm325_vm4, %v2605_v33, -1e+30  ;;  %v2838_v37 = vsel %vm325_vm4, %v2681_v34, -1e+30 }
 0xee2   : > { %v3963_v38 = vpop.f32.mrf.mxu0  ;;  %v3968_v41 = vpop.f32.mrf.mxu1  ;;  %v2841_v29 = vsel %vm879_vm3, %v2837_v35, -inf  ;;  %v2844_v39 = vsel %vm879_vm3, %v2838_v37, -inf }
 0xee3   : > { %2842 = vmax.xlane.f32.xlu0 %v2841_v29  ;;  %2845 = vmax.xlane.f32.xlu1 %v2844_v39 }
 0xee4   : > { %v2757_v42 = vpop.f32.mrf.mxu0  ;;  %v2833_v49 = vpop.f32.mrf.mxu1 }
 0xee5   : > { %v2839_v50 = vsel %vm325_vm4, %v2757_v42, -1e+30  ;;  %v2840_v44 = vsel %vm325_vm4, %v2833_v49, -1e+30 }
 0xee6   : > { %v3973_v46 = vpop.f32.mrf.mxu0  ;;  %v3978_v56 = vpop.f32.mrf.mxu1  ;;  %v2847_v57 = vsel %vm879_vm3, %v2839_v50, -inf  ;;  %v2850_v59 = vsel %vm879_vm3, %v2840_v44, -inf }
 0xee7   : > { %2848 = vmax.xlane.f32.xlu0 %v2847_v57 }
 0xeeb   : > { %2851 = vmax.xlane.f32.xlu0 %v2850_v59 }
 0xef4   : > { %2385 = vrot.lane.b32.xlu1 %v4766_v51, %s4200_s12 }
 0xf6c   : > { %v2843_v63 = vpop.xlane.xlu0 %2842  ;;  %v2846_v0 = vpop.xlane.xlu1 %2845 }
 0xf6d   : > { %v2853_v2 = vsub.f32 %v2837_v35, %v2843_v63  ;;  %v2854_v3 = vsub.f32 %v2838_v37, %v2846_v0 }
 0xf6f   : > { %v2857_v4 = vmul.f32 1.442695, %v2853_v2  ;;  %v2859_v6 = vmul.f32 1.442695, %v2854_v3 }
 0xf70   : > { %v2849_v7 = vpop.xlane.xlu0 %2848  ;;  %v2386_v13 = vpop.permute.xlu1 %2385 }
 0xf71   : > { %4108 = vpow2.f32 %v2857_v4  ;;  %v2855_v9 = vsub.f32 %v2839_v50, %v2849_v7 }
 0xf72   : > { %4110 = vpow2.f32 %v2859_v6 }
 0xf73   : > { %v2861_v10 = vmul.f32 1.442695, %v2855_v9 }
 0xf74   : > { %v2852_v43 = vpop.xlane.xlu0 %2851 }
 0xf75   : > { %4112 = vpow2.f32 %v2861_v10  ;;  %v2856_v11 = vsub.f32 %v2840_v44, %v2852_v43 }
 0xf77   : > { %v2863_v12 = vmul.f32 1.442695, %v2856_v11 }
 0xf79   : > { %4114 = vpow2.f32 %v2863_v12 }
 0xf7e   : > { %v4862_v14 = vpop.eup %4108 }
 0xf7f   : > { %v4864_v60 = vpop.eup %4110  ;;  %v2865_v51 = vsel %vm879_vm3, %v4862_v14, 0.0 }
 0xf80   : > { %2866 = vadd.xlane.f32.xlu1 %v2865_v51  ;;  %v2868_v58 = vsel %vm879_vm3, %v4864_v60, 0.0 }
 0xf81   : > { %2869 = vadd.xlane.f32.xlu0 %v2868_v58 }
 0xf82   : > { %v4870_v16 = vpop.eup %4112 }
 0xf83   : > { %v2871_v18 = vsel %vm879_vm3, %v4870_v16, 0.0 }
 0xf84   : > { %2872 = vadd.xlane.f32.xlu1 %v2871_v18 }
 0xf86   : > { %v4874_v19 = vpop.eup %4114 }
 0xf87   : > { %v2874_v20 = vsel %vm879_vm3, %v4874_v19, 0.0 }
 0xf88   : > { %2875 = vadd.xlane.f32.xlu0 %v2874_v20 }
 0xf95   : > { %2389 = vrot.lane.b32.xlu1 %v4780_v55, %s4200_s12 }
 0xf99   : > { %2391 = vrot.lane.b32.xlu1 %v4784_v54, %s4200_s12 }
 0xf9d   : > { %3340 = vrot.lane.b32.xlu1 %v4730_v30, %s4201_s13 }
 0xf9e   : > { %2387 = vrot.lane.b32.xlu0 %v4776_v48, %s4200_s12 }
 0xfa1   : > { %3338 = vrot.lane.b32.xlu1 %v4736_v31, %s4201_s13 }
 0xfa2   : > { %3342 = vrot.lane.b32.xlu0 %v4724_v47, %s4201_s13 }
0x1009   : > { %v2867_v23 = vpop.xlane.xlu1 %2866 }
0x100a   : > { %v2870_v61 = vpop.xlane.xlu0 %2869  ;;  %4116 = vrcp.f32 %v2867_v23 }
0x100b   : > { %4118 = vrcp.f32 %v2870_v61 }
0x100d   : > { %v2873_v62 = vpop.xlane.xlu1 %2872 }
0x100e   : > { %4120 = vrcp.f32 %v2873_v62 }
0x1011   : > { %v2390_v55 = vpop.permute.xlu1 %2389  ;;  %v2876_v26 = vpop.xlane.xlu0 %2875 }
0x1012   : > { %v2397_v15 = vcombine.low %v2386_v13, %v2390_v55  ;;  %v2398_v54 = vcombine.high %v2386_v13, %v2390_v55  ;;  %4122 = vrcp.f32 %v2876_v26 }
0x1014   : > { %v2405_v48 = vrot.slane %v2397_v15, %v4483_v8  ;;  %v2412_v31 = vrot.slane %v2398_v54, %v4483_v8 }
0x1015   : > { %v2392_v27 = vpop.permute.xlu1 %2391  ;;  %v2388_v22 = vpop.permute.xlu0 %2387 }
0x1016   : > { %v2413_v30 = vcombine.low %v2388_v22, %v2392_v27  ;;  %v2414_v28 = vcombine.high %v2388_v22, %v2392_v27 }
0x1017   : > { %v4117_v4 = vpop.eup %4116 }
0x1018   : > { %v2421_v47 = vrot.slane %v2413_v30, %v4483_v8  ;;  %v2428_v24 = vrot.slane %v2414_v28, %v4483_v8  ;;  %v4119_v6 = vpop.eup %4118  ;;  %v2878_v58 = vmul.f32 %v4117_v4, %v4862_v14 }
0x1019   : > { %v2880_v18 = vmul.f32 %v4119_v6, %v4864_v60  ;;  %v3341_v60 = vpop.permute.xlu1 %3340 }
0x101a   : > { %v2429_v33 = vcombine.low %v2405_v48, %v2421_v47  ;;  %v2430_v34 = vcombine.high %v2405_v48, %v2421_v47  ;;  %v2445_v35 = vcombine.low %v2412_v31, %v2428_v24  ;;  %v2446_v37 = vcombine.high %v2412_v31, %v2428_v24 }
0x101b   : > { %v4121_v11 = vpop.eup %4120 }
0x101c   : > { %v2437_v38 = vrot.slane %v2429_v33, %v4494_v17  ;;  %v2444_v41 = vrot.slane %v2430_v34, %v4494_v17  ;;  %v2453_v29 = vrot.slane %v2445_v35, %v4494_v17  ;;  %v2460_v39 = vrot.slane %v2446_v37, %v4494_v17 }
0x101d   : > { %v2882_v61 = vmul.f32 %v4121_v11, %v4870_v16  ;;  %v3343_v16 = vpop.permute.xlu0 %3342 }
0x101e   : > { %v2465_v42 = vcombine.low %v2437_v38, %v2444_v41  ;;  %v3765_v49 = vcombine.high %v2437_v38, %v2444_v41  ;;  %v2481_v50 = vcombine.low %v2453_v29, %v2460_v39  ;;  %v3766_v46 = vcombine.high %v2453_v29, %v2460_v39 }
0x101f   : > { %v4123_v20 = vpop.eup %4122 }
0x1020   : > { %v2472_v56 = vrot.slane %v2465_v42, %v4483_v8  ;;  %v2480_v57 = vrot.slane %v3765_v49, %v4483_v8  ;;  %v2488_v44 = vrot.slane %v2481_v50, %v4483_v8  ;;  %v2496_v59 = vrot.slane %v3766_v46, %v4483_v8 }
0x1021   : > { %v2884_v14 = vmul.f32 %v4123_v20, %v4874_v19  ;;  %v3339_v19 = vpop.permute.xlu1 %3338 }
0x1022   : > { %v2497_v63 = vcombine.low %v2472_v56, %v2480_v57  ;;  %v2513_v0 = vcombine.low %v2488_v44, %v2496_v59  ;;  %v2498_v2 = vcombine.high %v2472_v56, %v2480_v57  ;;  %v2514_v3 = vcombine.high %v2488_v44, %v2496_v59 }
0x1024   : > { %v2505_v7 = vrot.slane %v2497_v63, %v4494_v17  ;;  %v2521_v9 = vrot.slane %v2513_v0, %v4494_v17  ;;  %v2512_v10 = vrot.slane %v2498_v2, %v4494_v17  ;;  %v2528_v43 = vrot.slane %v2514_v3, %v4494_v17 }
0x1026   : > { %v2529_v12 = vcombine.low %v2505_v7, %v2521_v9  ;;  %v2530_v51 = vcombine.high %v2505_v7, %v2521_v9  ;;  %v2531_v13 = vcombine.low %v2512_v10, %v2528_v43  ;;  %v2532_v23 = vcombine.high %v2512_v10, %v2528_v43 }
0x1028   : > { %3980 = vmatpush3.msra.mxu0 %v2529_v12  ;;  %3985 = vmatpush3.msra.mxu1 %v2530_v51 }
0x1029   : > { %3982 = vmatmul.mubr.msk.f32.vlgmr.msra.gmra.mxu0 %vm879_vm3, %v2878_v58  ;;  %3987 = vmatmul.mubr.msk.f32.vlgmr.msra.gmra.mxu1 %vm879_vm3, %v2880_v18 }
0x102a   : > { %3989 = vmatprep.subr.mxu0 %v4192_v1  ;;  %3994 = vmatprep.subr.mxu1 %v4192_v1 }
0x102b   : > { %3990 = vmatpush3.msra.mxu0 %v2531_v13  ;;  %3995 = vmatpush3.msra.mxu1 %v2532_v23 }
0x102c   : > { %3991 = vmatprep.mubr.msk.f32.mxu0 %vm4193_vm2, %v4192_v1  ;;  %3996 = vmatprep.mubr.msk.f32.mxu1 %vm4193_vm2, %v4192_v1 }
0x102d   : > { %3992 = vmatmul.mubr.msk.f32.vlgmr.msra.gmra.mxu0 %vm879_vm3, %v2882_v61  ;;  %3997 = vmatmul.mubr.msk.f32.vlgmr.msra.gmra.mxu1 %vm879_vm3, %v2884_v14 }
0x102e   : > { %3999 = vmatprep.subr.mxu0 %v4192_v1  ;;  %4007 = vmatprep.mubr.msk.f32.mxu0 %vm4193_vm2, %v4192_v1 }
0x102f   : > { %4010 = vmatprep.subr.mxu1 %v4192_v1  ;;  %4018 = vmatprep.mubr.msk.f32.mxu1 %vm4193_vm2, %v4192_v1 }
0x1030   : > { %4000 = vmatpush3.msra.mxu0 %v3343_v16 }
0x1031   : > { %4001 = vmatprep.subr.mxu0 %v4192_v1 }
0x1032   : > { %4002 = vmatpush3.msra.mxu0 %v3341_v60 }
0x1033   : > { %4003 = vmatprep.subr.mxu0 %v4192_v1 }
0x1034   : > { %4004 = vmatpush3.msra.mxu0 %v3339_v19 }
0x1035   : > { %4005 = vmatprep.subr.mxu0 %v4192_v1 }
0x10e9   : > { %v2954_v62 = vpop.f32.mrf.mxu0  ;;  %v3027_v55 = vpop.f32.mrf.mxu1 }
0x10eb   : > { %v3983_v26 = vpop.f32.mrf.mxu0  ;;  %v3988_v15 = vpop.f32.mrf.mxu1 }
0x10ed   : > { %v3100_v54 = vpop.f32.mrf.mxu0  ;;  %v3173_v27 = vpop.f32.mrf.mxu1 }
0x10ee   : > { %v3177_v22 = vcombine.low %v2954_v62, %v3100_v54  ;;  %v3178_v30 = vcombine.high %v2954_v62, %v3100_v54  ;;  %v3193_v28 = vcombine.low %v3027_v55, %v3173_v27  ;;  %v3194_v48 = vcombine.high %v3027_v55, %v3173_v27 }
0x10ef   : > { %v3993_v31 = vpop.f32.mrf.mxu0  ;;  %v3998_v47 = vpop.f32.mrf.mxu1 }
0x10f0   : > { %v3185_v24 = vrot.slane %v3177_v22, %v4483_v8  ;;  %v3192_v33 = vrot.slane %v3178_v30, %v4483_v8  ;;  %v3201_v34 = vrot.slane %v3193_v28, %v4483_v8  ;;  %v3208_v35 = vrot.slane %v3194_v48, %v4483_v8  ;;  %v3754_v30 = vld [vmem:[%s5054_s3 + $0x58] sm:$0xff]  ;;  %v3752_v28 = vld [vmem:[%s5054_s3 + $0x48] sm:$0xff] }
0x10f2   : > { %v3209_v37 = vcombine.low %v3185_v24, %v3201_v34  ;;  %v3210_v38 = vcombine.high %v3185_v24, %v3201_v34  ;;  %v3225_v41 = vcombine.low %v3192_v33, %v3208_v35  ;;  %v3226_v29 = vcombine.high %v3192_v33, %v3208_v35 }
0x10f3   : > { %v3438_v24 = vrot.slane %v4752_v36, %v1788_v52  ;;  %v3443_v35 = vrot.slane %v4752_v36, %v1793_v53 }
0x10f4   : > { %v3217_v39 = vrot.slane %v3209_v37, %v4494_v17  ;;  %v3224_v42 = vrot.slane %v3210_v38, %v4494_v17  ;;  %v3233_v49 = vrot.slane %v3225_v41, %v4494_v17  ;;  %v3240_v50 = vrot.slane %v3226_v29, %v4494_v17 }
0x10f6   : > { %v3245_v46 = vcombine.low %v3217_v39, %v3224_v42  ;;  %v3779_v56 = vcombine.high %v3217_v39, %v3224_v42  ;;  %v3261_v57 = vcombine.low %v3233_v49, %v3240_v50  ;;  %v3780_v44 = vcombine.high %v3233_v49, %v3240_v50 }
0x10f7   : > { %v3448_v39 = vrot.slane %v4752_v36, %v1798_v5 }
0x10f8   : > { %v3252_v59 = vrot.slane %v3245_v46, %v4483_v8  ;;  %v3260_v63 = vrot.slane %v3779_v56, %v4483_v8  ;;  %v3268_v0 = vrot.slane %v3261_v57, %v4483_v8  ;;  %v3276_v2 = vrot.slane %v3780_v44, %v4483_v8 }
0x10fa   : > { %v3278_v3 = vcombine.high %v3252_v59, %v3260_v63  ;;  %v3294_v4 = vcombine.high %v3268_v0, %v3276_v2  ;;  %v3277_v6 = vcombine.low %v3252_v59, %v3260_v63  ;;  %v3293_v7 = vcombine.low %v3268_v0, %v3276_v2 }
0x10fc   : > { %v3292_v9 = vrot.slane %v3278_v3, %v4494_v17  ;;  %v3308_v10 = vrot.slane %v3294_v4, %v4494_v17  ;;  %v3285_v43 = vrot.slane %v3277_v6, %v4494_v17  ;;  %v3301_v11 = vrot.slane %v3293_v7, %v4494_v17 }
0x10fd   : > { %v3534_v3 = vrot.slane %v4752_v36, %v1884_v21 }
0x10fe   : > { %v3312_v12 = vcombine.high %v3292_v9, %v3308_v10  ;;  %v3310_v51 = vcombine.high %v3285_v43, %v3301_v11  ;;  %v3309_v58 = vcombine.low %v3285_v43, %v3301_v11  ;;  %v3311_v8 = vcombine.low %v3292_v9, %v3308_v10 }
0x1100   : > { %3322 = vrot.lane.b32.xlu1 %v3312_v12, %s4204_s15  ;;  %3314 = vrot.lane.b32.xlu0 %v3310_v51, %s4202_s17  ;;  %s4205_s17 = smov [#allocation2]  }
0x1104   : > { %3318 = vrot.lane.b32.xlu0 %v3311_v8, %s4203_s14  ;;  %v3629_v8 = vld [vmem:[%s5053_s2 + $0x8] sm:$0x1]  ;;  %s4134_s14 = sshll.u32 %s4205_s17, 4  ;;  %s4135_s14 = int_to_ptr.vmem [resolvable:$false] %s4134_s14 }
0x1105   : > { %s4136_s22 = scalar_lea.vmem %s4135_s14, 32 }
0x1108   : > { %3336 = vrot.lane.b32.xlu0 %v4743_v32, %s4201_s13  ;;  %v3331_v32 = vrot.slane %v4752_v36, %v1681_v40  ;;  %v3758_v40 = vld [vmem:[%s5054_s3 + $0x78] sm:$0xff] }
0x1109   : > { %4011 = vmatpush3.msra.mxu1 %v3758_v40 }
0x110a   : > { %4012 = vmatprep.subr.mxu1 %v4192_v1 }
0x1172   : > { %v3315_v18 = vpop.permute.xlu0 %3314  ;;  %v3323_v17 = vpop.permute.xlu1 %3322 }
0x1173   : > { %v3325_v13 = vsel %vm879_vm3, %v3309_v58, %v3315_v18 }
0x1176   : > { %v3319_v20 = vpop.permute.xlu0 %3318 }
0x1177   : > { %v3326_v23 = vsel %vm1675_vm5, %v3325_v13, %v3319_v20  ;;  %v3630_v20 = vld [vmem:[%s5053_s2 + $0x9] sm:$0x1] }
0x1178   : > { %v3327_v14 = vsel %vm1677_vm6, %v3326_v23, %v3323_v17 }
0x117a   : > { %v3337_v61 = vpop.permute.xlu0 %3336 }
0x117b   : > { %4006 = vmatpush3.msra.mxu0 %v3337_v61 }
0x117c   : > { %4008 = vmatmul.mubr.msk.f32.vlgmr.msra.gmra.mxu0 %vm335_vm1, %v3327_v14  ;;  %4021 = vmatprep.subr.mxu0 %v4192_v1 }
0x117d   : > { %4029 = vmatprep.mubr.msk.f32.mxu0 %vm4193_vm2, %v4192_v1 }
0x123c   : > { %v3417_v60 = vpop.f32.mrf.mxu0 }
0x123d   : > { %v3418_v16 = vadd.f32 %v3417_v60, %v3331_v32 }
0x123e   : > { %v4009_v19 = vpop.f32.mrf.mxu0 }
0x123f   : > { %v4961_v62 = vadd.f32 %v3418_v16, %v4715_v25  ;;  %v3756_v25 = vld [vmem:[%s5054_s3 + $0x68] sm:$0xff] }
0x1240   : > { %4013 = vmatpush3.msra.mxu1 %v3756_v25 }
0x1241   : > { %v3422_v55 = vsel %vm335_vm1, %v4961_v62, 0.0  ;;  %4014 = vmatprep.subr.mxu1 %v4192_v1 }
0x1242   : > { %3423 = vadd.xlane.f32.xlu1 %v3422_v55  ;;  %4015 = vmatpush3.msra.mxu1 %v3754_v30 }
0x1243   : > { %4016 = vmatprep.subr.mxu1 %v4192_v1 }
0x1244   : > { %4017 = vmatpush3.msra.mxu1 %v3752_v28 }
0x1253   : > { %3543 = vrot.lane.b32.xlu1 %v3756_v25, %s4200_s12 }
0x1257   : > { %3541 = vrot.lane.b32.xlu1 %v3754_v30, %s4200_s12 }
0x12cb   : > { %v3424_v26 = vpop.xlane.xlu1 %3423 }
0x12cc   : > { %v3425_v15 = vmul.f32 0.03125, %v3424_v26 }
0x12ce   : > { %v3426_v54 = vsub.f32 %v4961_v62, %v3425_v15 }
0x12cf   : > { %v3544_v29 = vpop.permute.xlu1 %3543 }
0x12d0   : > { %v3427_v27 = vmul.f32 %v3426_v54, %v3426_v54 }
0x12d2   : > { %v3428_v22 = vsel %vm335_vm1, %v3427_v27, 0.0 }
0x12d3   : > { %3429 = vadd.xlane.f32.xlu0 %v3428_v22  ;;  %v3542_v52 = vpop.permute.xlu1 %3541 }
0x12e9   : > { %3545 = vrot.lane.b32.xlu0 %v3758_v40, %s4200_s12 }
0x12ed   : > { %3539 = vrot.lane.b32.xlu0 %v3752_v28, %s4200_s12  ;;  %s215_s12 = sand.u32 1, %s4182_s19  }
0x12ee   : > { %s216_s25 = scalar_lea.vmem [#allocation2], %s215_s12  ;;  %s3649_s11 = scalar_lea.sflag [#allocation3], %s215_s12 }
0x12ef   : > { %s3661_s26 = sshll.u32 %s216_s25, 4  ;;  %s3662_s26 = int_to_ptr.vmem [resolvable:$true] %s3661_s26 }
0x12f0   : > { %s4130_s13 = scalar_lea.vmem %s3662_s26, 16  ;;  %p4137_p0 = scmp.lt.s32.totalorder %s3662_s26, %s4135_s14 }
0x12f1   : > { %p4131_p11 = scmp.ne.s32.totalorder %s3662_s26, %s4130_s13  ;;  %p4138_p1 = scmp.lt.s32.totalorder %s4136_s22, %s4130_s13 }
0x12f3   : > { %p4132_p12 = pnand %p4131_p11, %p4274_p5  ;;  %p4139_p2 = por %p4138_p1, %p4137_p0 }
0x12f5   : > { %p4133_p13 = pneg %p4132_p12 }
0x12f7   : > { %p4140_p3 = pnand %p4139_p2, %p4133_p13 }
0x135c   : > { %v3430_v48 = vpop.xlane.xlu0 %3429 }
0x135d   : > { %v3431_v31 = vmul.f32 0.03125, %v3430_v48 }
0x135f   : > { %v3432_v47 = vadd.f32 1e-12, %v3431_v31 }
0x1360   : > { %v3546_v41 = vpop.permute.xlu0 %3545 }
0x1361   : > { %4124 = vrsqrt.f32 %v3432_v47  ;;  %4022 = vmatpush3.xpose.msk.msra.mxu0 %vm249_vm0, %v3546_v41 }
0x1362   : > { %4023 = vmatprep.subr.mxu0 %v4192_v1 }
0x1364   : > { %v3540_v53 = vpop.permute.xlu0 %3539 }
0x1365   : > { %4024 = vmatpush3.xpose.msk.msra.mxu0 %vm249_vm0, %v3544_v29 }
0x1366   : > { %4025 = vmatprep.subr.mxu0 %v4192_v1 }
0x1369   : > { %4026 = vmatpush3.xpose.msk.msra.mxu0 %vm249_vm0, %v3542_v52 }
0x136a   : > { %4027 = vmatprep.subr.mxu0 %v4192_v1 }
0x136d   : > { %4028 = vmatpush3.xpose.msk.msra.mxu0 %vm249_vm0, %v3540_v53 }
0x136e   : > { %v4125_v33 = vpop.eup %4124 }
0x136f   : > { %v3434_v34 = vmul.f32 %v4125_v33, %v3426_v54 }
0x1371   : > { %v3439_v37 = vmul.f32 %v3438_v24, %v3434_v34 }
0x1373   : > { %v3444_v38 = vadd.f32 %v3443_v35, %v3439_v37 }
0x1375   : > { %4019 = vmatmul.mubr.msk.f32.vlgmr.msra.gmra.mxu1 %vm335_vm1, %v3444_v38 }
0x1435   : > { %v3518_v42 = vpop.f32.mrf.mxu1 }
0x1436   : > { %v3519_v49 = vadd.f32 %v3518_v42, %v3448_v39 }
0x1437   : > { %v4020_v50 = vpop.f32.mrf.mxu1 }
0x1438   : > { %v3522_v46 = vmul.f32 %v3519_v49, %v3519_v49 }
0x143a   : > { %v3523_v56 = vmul.f32 %v3522_v46, %v3519_v49 }
0x143c   : > { %v3524_v57 = vmul.f32 0.044715, %v3523_v56 }
0x143e   : > { %v3525_v44 = vadd.f32 %v3524_v57, %v3519_v49 }
0x1440   : > { %v3526_v59 = vmul.f32 0.7978846, %v3525_v44 }
0x1442   : > { %4126 = vtanh.f32 %v3526_v59 }
0x144f   : > { %v4127_v63 = vpop.eup %4126 }
0x1450   : > { %v3528_v0 = vadd.f32 1.0, %v4127_v63 }
0x1452   : > { %v3529_v2 = vmul.f32 0.5, %v3528_v0 }
0x1454   : > { %v3530_v1 = vmul.f32 %v3529_v2, %v3519_v49 }
0x1456   : > { %4030 = vmatmul.mubr.msk.f32.vlgmr.msra.gmra.mxu0 %vm249_vm0, %v3530_v1 }
0x1516   : > { %v3624_v5 = vpop.f32.mrf.mxu0 }
0x1517   : > { %v3625_v4 = vadd.f32 %v3624_v5, %v3534_v3 }
0x1518   : > { %v4031_v6 = vpop.f32.mrf.mxu0 }
0x1519   : > { %v3628_v7 = vadd.f32 %v3625_v4, %v4961_v62 }
0x151b   : > { %v3632_v9 = vsel %vm3631_vm7, %v3628_v7, 0.0 }
0x151c   : > { %3633 = vadd.xlane.f32.xlu1 %v3632_v9 }
0x15a5   : > { %v3634_v10 = vpop.xlane.xlu1 %3633 }
0x15a6   : > { %v3635_v43 = vmul.f32 0.03125, %v3634_v10 }
0x15a8   : > { %v3636_v11 = vsub.f32 %v3628_v7, %v3635_v43 }
0x15aa   : > { %v3637_v12 = vmul.f32 %v3636_v11, %v3636_v11 }
0x15ac   : > { %v3638_v51 = vsel %vm3631_vm7, %v3637_v12, 0.0 }
0x15ad   : > { %3639 = vadd.xlane.f32.xlu0 %v3638_v51 }
0x1636   : > { %v3640_v45 = vpop.xlane.xlu0 %3639 }
0x1637   : > { %v3641_v21 = vmul.f32 0.03125, %v3640_v45 }
0x1639   : > { %v3642_v36 = vadd.f32 1e-12, %v3641_v21 }
0x163b   : > { %4128 = vrsqrt.f32 %v3642_v36 }
0x1648   : > { %v4129_v58 = vpop.eup %4128 }
0x1649   : > { %v3644_v18 = vmul.f32 %v4129_v58, %v3636_v11 }
0x164b   : > { %v3645_v13 = vmul.f32 %v3644_v18, %v3629_v8 }
0x164d   : > { %v3646_v23 = vadd.f32 %v3645_v13, %v3630_v20 }
0x164f   : > { %3647 = vst.msk [vmem:[%s216_s25] sm:$0x1] %vm3631_vm7, %v3646_v23 }
0x1650   : > { %4143 = shalt.err (!%p4140_p3)
}
0x1651   : > { %s4144_s15 = scalar_lea.hbm %s3659_s10, 16  ;;  %s4148_s6 = scalar_lea.hbm %s5056_s5, 32 }
0x1652   : > { %p4145_p4 = scmp.ne.s32.totalorder %s3659_s10, %s4144_s15  ;;  %p4149_p9 = scmp.lt.s32.totalorder %s3659_s10, %s5056_s5 }
0x1653   : > { %p4150_p10 = scmp.lt.s32.totalorder %s4148_s6, %s4144_s15 }
0x1654   : > { %p4146_p7 = pnand %p4145_p4, %p4274_p5 }
0x1655   : > { %p4151_p11 = por %p4150_p10, %p4149_p9 }
0x1656   : > { %p4147_p8 = pneg %p4146_p7 }
0x1658   : > { %p4152_p12 = pnand %p4151_p11, %p4147_p8 }
0x165a   : > { %4155 = shalt.err (!%p4152_p12)
}
0x165b   : > { %4032 = dma.vmem_to_hbm [thread:$0]  (%p4274_p5), %s3662_s26, 16, %s3659_s10, %s3649_s11  }
0x165c PF: > { %p4038_p13 = scmp.ge.s32.totalorder %s4190_s21, 2  ;;  %s3673_s23 = sand.u32 1, %s4178_s18  }
0x165d   : > { %s3674_s25 = scalar_lea.sflag [#allocation3], %s3673_s23 }
0x165e   : > { %p4035_p0 = pnand %p4038_p13, %p4278_p6 }
0x1660   : > { %p4036_p1 = pneg %p4035_p0 }
0x1662   : > { %4173 = dma.done.wait (%p4036_p1), %s3674_s25, 16  }
0x1663   : > { %4175 = vsyncadd (%p4036_p1), %s3674_s25, 4294967280  ;;  %p15_p2 = scmp.ge.s32.totalorder %s4261_s24, 4   ;;  %s5059_s18 = smov %s4182_s19 }
0x1664   : > { %s5060_s19 = smov %s4186_s20  ;;  %s5061_s20 = smov %s4272_s27 }
0x1665   : > { %s5062_s21 = smov %s4261_s24  ;;  %17 = sbr.rel (!%p15_p2) target bundleno = 3 (0x3), region = 77 }
0x166a   :  { %3678 = vsyncpa [#allocation3], 1 }
0x166b   :  { %3680 = vsyncpa [#allocation3 + $0x1], 1 }

</bundles_post_ra>
